<compile_context>
chip_gen: v5e
topology: v5e:2x2
jax: 0.10.0
libtpu: 0.0.40
codegen_flags: <defaults>
</compile_context>

<pallas_src>
import functools
import numpy as np
import jax
import jax.numpy as jnp
from jax import lax
from jax.experimental import pallas as pl
from jax.experimental.pallas import tpu as pltpu

# CLIP normalization constants (from the module's registered buffers).
CLIP_MEAN = np.array([0.48145466, 0.4578275, 0.40821073], np.float32)
CLIP_STD = np.array([0.26862954, 0.26130258, 0.27577711], np.float32)


# ---------------------------------------------------------------------------
# Bicubic interpolation matrix (align_corners=True, PyTorch A=-0.75).
# Built in numpy at trace/setup time; applied inside a Pallas kernel.
# ---------------------------------------------------------------------------
def bicubic_matrix(in_size: int, out_size: int, a: float = -0.75) -> np.ndarray:
    W = np.zeros((out_size, in_size), dtype=np.float32)
    scale = 0.0 if out_size == 1 else (in_size - 1) / (out_size - 1)
    for i in range(out_size):
        s = i * scale
        f = int(np.floor(s))
        t = s - f
        for k in range(-1, 3):
            d = abs(t - k)
            if d <= 1.0:
                w = (a + 2.0) * d**3 - (a + 3.0) * d**2 + 1.0
            elif d < 2.0:
                w = a * d**3 - 5.0 * a * d**2 + 8.0 * a * d - 4.0 * a
            else:
                w = 0.0
            idx = min(max(f + k, 0), in_size - 1)
            W[i, idx] += w
    return W


# ---------------------------------------------------------------------------
# Shared in-kernel LayerNorm (eps=1e-5, as torch.nn.LayerNorm). f32 math.
# ---------------------------------------------------------------------------
def _layer_norm(x, g, b, eps=1e-5):
    mu = jnp.mean(x, axis=-1, keepdims=True)
    xc = x - mu
    var = jnp.mean(xc * xc, axis=-1, keepdims=True)
    return xc * lax.rsqrt(var + eps) * g + b


# ---------------------------------------------------------------------------
# Kernel 1: separable bicubic resize, one image (all channels) per grid step.
# Normalization is folded into the patch-embed weights, so this is a pure resize.
# ---------------------------------------------------------------------------
def _resize_kernel(C, x_ref, wh_ref, ww_ref, o_ref):
    bf16 = jnp.bfloat16
    wh = wh_ref[...].astype(bf16)          # (R, H)
    ww = ww_ref[...].astype(bf16)          # (R, W)
    for c in range(C):                      # C=3, statically unrolled
        xc = x_ref[0, c].astype(bf16)       # (H, W)
        t = jnp.dot(wh, xc, preferred_element_type=jnp.float32)            # (R, W)
        r = lax.dot_general(t.astype(bf16), ww, (((1,), (1,)), ((), ())),
                            preferred_element_type=jnp.float32)            # (R, R)
        o_ref[0, c] = r


def resize_pallas(x, wh, ww):
    B, C, H, W = x.shape
    R = wh.shape[0]
    return pl.pallas_call(
        functools.partial(_resize_kernel, C),
        out_shape=jax.ShapeDtypeStruct((B, C, R, R), jnp.float32),
        grid=(B,),
        in_specs=[
            pl.BlockSpec((1, C, H, W), lambda b: (b, 0, 0, 0)),
            pl.BlockSpec((R, H), lambda b: (0, 0)),
            pl.BlockSpec((R, W), lambda b: (0, 0)),
        ],
        out_specs=pl.BlockSpec((1, C, R, R), lambda b: (b, 0, 0, 0)),
        compiler_params=pltpu.CompilerParams(dimension_semantics=("parallel",)),
    )(x, wh, ww)


# ---------------------------------------------------------------------------
# Kernel 2: fused patch-embed + class token + positional embedding + ln_pre.
# `patches_pad` has a leading zero row per image (the cls slot); `add_tab` holds
# class_emb+pos[0] on row 0 and conv-bias+pos[i] on the other rows.
# ---------------------------------------------------------------------------
def _embed_kernel(p_ref, wp_ref, add_ref, g_ref, b_ref, o_ref):
    bf16 = jnp.bfloat16
    tok = jnp.dot(p_ref[0].astype(bf16), wp_ref[...].astype(bf16),
                  preferred_element_type=jnp.float32)          # (S, width)
    x = tok + add_ref[...]
    o_ref[0] = _layer_norm(x, g_ref[...], b_ref[...])


def embed_pallas(patches_pad, prep):
    B, S, K = patches_pad.shape
    Wd = prep["wp"].shape[1]
    return pl.pallas_call(
        _embed_kernel,
        out_shape=jax.ShapeDtypeStruct((B, S, Wd), jnp.float32),
        grid=(B,),
        in_specs=[
            pl.BlockSpec((1, S, K), lambda b: (b, 0, 0)),
            pl.BlockSpec((K, Wd), lambda b: (0, 0)),
            pl.BlockSpec((S, Wd), lambda b: (0, 0)),
            pl.BlockSpec((1, Wd), lambda b: (0, 0)),
            pl.BlockSpec((1, Wd), lambda b: (0, 0)),
        ],
        out_specs=pl.BlockSpec((1, S, Wd), lambda b: (b, 0, 0)),
        compiler_params=pltpu.CompilerParams(dimension_semantics=("parallel",)),
    )(patches_pad, prep["wp"], prep["add_tab"], prep["ln_pre_g"], prep["ln_pre_b"])


# ---------------------------------------------------------------------------
# Kernel 3: one full residual transformer block per pallas_call, grid over batch.
# Per-head Q/K/V/out-proj weights pre-split on the host so no lane slicing occurs.
# ---------------------------------------------------------------------------
def _block_kernel(heads, scale,
                  x_ref, ln1g_ref, ln1b_ref,
                  wq_ref, bq_ref, wk_ref, bk_ref, wv_ref, bv_ref,
                  wo_ref, bo_ref, ln2g_ref, ln2b_ref,
                  wfc_ref, bfc_ref, wcp_ref, bcp_ref, o_ref):
    bf16 = jnp.bfloat16
    x = x_ref[0]                                                 # (S, width) f32

    # ---- x = x + out_proj(MHA(ln_1(x))) ----
    h = _layer_norm(x, ln1g_ref[...], ln1b_ref[...])
    hb = h.astype(bf16)
    acc = None
    for hh in range(heads):                                      # statically unrolled
        q = jnp.dot(hb, wq_ref[hh].astype(bf16),
                    preferred_element_type=jnp.float32) + bq_ref[hh]   # (S, Dh)
        k = jnp.dot(hb, wk_ref[hh].astype(bf16),
                    preferred_element_type=jnp.float32) + bk_ref[hh]
        v = jnp.dot(hb, wv_ref[hh].astype(bf16),
                    preferred_element_type=jnp.float32) + bv_ref[hh]
        s = lax.dot_general(q.astype(bf16), k.astype(bf16),
                            (((1,), (1,)), ((), ())),
                            preferred_element_type=jnp.float32) * scale  # (S, S)
        s = s - jnp.max(s, axis=-1, keepdims=True)
        p = jnp.exp(s)
        p = p * pl.reciprocal(jnp.sum(p, axis=-1, keepdims=True), approx=True)
        o_h = jnp.dot(p.astype(bf16), v.astype(bf16),
                      preferred_element_type=jnp.float32)               # (S, Dh)
        c_h = jnp.dot(o_h.astype(bf16), wo_ref[hh].astype(bf16),
                      preferred_element_type=jnp.float32)               # (S, width)
        acc = c_h if acc is None else acc + c_h
    x = x + acc + bo_ref[...]

    # ---- x = x + c_proj(QuickGELU(c_fc(ln_2(x)))) ----
    h2 = _layer_norm(x, ln2g_ref[...], ln2b_ref[...])
    f = jnp.dot(h2.astype(bf16), wfc_ref[...].astype(bf16),
                preferred_element_type=jnp.float32) + bfc_ref[...]
    f = f * jax.nn.sigmoid(1.702 * f)                            # QuickGELU (f32)
    m = jnp.dot(f.astype(bf16), wcp_ref[...].astype(bf16),
                preferred_element_type=jnp.float32) + bcp_ref[...]
    o_ref[0] = x + m


def block_pallas(x, blk, *, heads):
    B, S, Wd = x.shape
    Dh = Wd // heads
    kern = functools.partial(_block_kernel, heads, 1.0 / float(np.sqrt(Dh)))

    def rep(shape):
        n = len(shape)
        return pl.BlockSpec(shape, lambda b: (0,) * n)

    seq_spec = pl.BlockSpec((1, S, Wd), lambda b: (b, 0, 0))
    return pl.pallas_call(
        kern,
        out_shape=jax.ShapeDtypeStruct((B, S, Wd), jnp.float32),
        grid=(B,),
        in_specs=[
            seq_spec,
            rep((1, Wd)), rep((1, Wd)),
            rep((heads, Wd, Dh)), rep((heads, 1, Dh)),
            rep((heads, Wd, Dh)), rep((heads, 1, Dh)),
            rep((heads, Wd, Dh)), rep((heads, 1, Dh)),
            rep((heads, Dh, Wd)), rep((1, Wd)),
            rep((1, Wd)), rep((1, Wd)),
            rep((Wd, 4 * Wd)), rep((1, 4 * Wd)),
            rep((4 * Wd, Wd)), rep((1, Wd)),
        ],
        out_specs=seq_spec,
        compiler_params=pltpu.CompilerParams(dimension_semantics=("parallel",)),
    )(x, blk["ln1_g"], blk["ln1_b"],
      blk["wq"], blk["bq"], blk["wk"], blk["bk"], blk["wv"], blk["bv"],
      blk["wo"], blk["bo"], blk["ln2_g"], blk["ln2_b"],
      blk["wfc"], blk["bfc"], blk["wcp"], blk["bcp"])


# ---------------------------------------------------------------------------
# Kernel 4: fused ln_post (on CLS token) + output projection.
# ---------------------------------------------------------------------------
def _head_kernel(x_ref, g_ref, b_ref, wp_ref, o_ref):
    bf16 = jnp.bfloat16
    x = _layer_norm(x_ref[...], g_ref[...], b_ref[...])
    o_ref[...] = jnp.dot(x.astype(bf16), wp_ref[...].astype(bf16),
                         preferred_element_type=jnp.float32)


def head_pallas(x_cls, prep):
    B, _ = x_cls.shape
    out_dim = prep["proj"].shape[1]
    return pl.pallas_call(
        _head_kernel,
        out_shape=jax.ShapeDtypeStruct((B, out_dim), jnp.float32),
    )(x_cls, prep["ln_post_g"], prep["ln_post_b"], prep["proj"])


# ---------------------------------------------------------------------------
# Synthetic deterministic CLIP-ViT parameters (shapes from CLIP's VisionTransformer).
# ---------------------------------------------------------------------------
def init_params(key, *, width=32, layers=2, heads=2, patch=8, resolution=16, out_dim=16):
    del heads
    grid = resolution // patch
    seq = grid * grid + 1
    keys = jax.random.split(key, 4 + layers)

    def nrm(k, shape, scale=0.02):
        return scale * jax.random.normal(k, shape, dtype=jnp.float32)

    params = dict(
        conv_w=nrm(keys[0], (width, 3, patch, patch)),   # Conv2d(3, width, patch, patch, bias=False)
        class_emb=nrm(keys[1], (width,)),
        pos_emb=nrm(keys[2], (seq, width)),
        ln_pre_g=jnp.ones((width,), jnp.float32), ln_pre_b=jnp.zeros((width,), jnp.float32),
        ln_post_g=jnp.ones((width,), jnp.float32), ln_post_b=jnp.zeros((width,), jnp.float32),
        proj=nrm(keys[3], (width, out_dim)),
        blocks=[],
    )
    for l in range(layers):
        bk = jax.random.split(keys[4 + l], 4)
        params["blocks"].append(dict(
            ln1_g=jnp.ones((width,), jnp.float32), ln1_b=jnp.zeros((width,), jnp.float32),
            qkv_w=nrm(bk[0], (width, 3 * width)), qkv_b=jnp.zeros((3 * width,), jnp.float32),
            out_w=nrm(bk[1], (width, width)), out_b=jnp.zeros((width,), jnp.float32),
            ln2_g=jnp.ones((width,), jnp.float32), ln2_b=jnp.zeros((width,), jnp.float32),
            fc_w=nrm(bk[2], (width, 4 * width)), fc_b=jnp.zeros((4 * width,), jnp.float32),
            cproj_w=nrm(bk[3], (4 * width, width)), cproj_b=jnp.zeros((width,), jnp.float32),
        ))
    return params


# ---------------------------------------------------------------------------
# One-time host-side weight reorganization:
#   * fold ((r+1)/2 - mean)/std into conv1 weights + bias (whole front end is linear),
#   * split fused QKV / out-proj weights per head,
#   * build the class-token/pos-emb additive table,
#   * reshape biases / LN params to (1, N) blocks.
# ---------------------------------------------------------------------------
def prepare_params(params, *, heads, patch):
    width, C = params["conv_w"].shape[0], params["conv_w"].shape[1]
    Dh = width // heads
    scale = jnp.asarray((1.0 / (2.0 * CLIP_STD)).astype(np.float32))        # (3,)
    shift = jnp.asarray(((0.5 - CLIP_MEAN) / CLIP_STD).astype(np.float32))  # (3,)

    conv_w = params["conv_w"]                                     # (width, C, p, p)
    w_fold = conv_w * scale[None, :, None, None]
    b_fold = jnp.sum(conv_w * shift[None, :, None, None], axis=(1, 2, 3))   # (width,)
    wp = w_fold.reshape(width, C * patch * patch).T               # (C*p*p, width)

    pos = params["pos_emb"]                                       # (S, width)
    add_tab = jnp.concatenate(
        [(params["class_emb"] + pos[0]).reshape(1, width),
         pos[1:] + b_fold[None, :]], axis=0)                      # (S, width)

    prep = dict(
        wp=wp, add_tab=add_tab,
        ln_pre_g=params["ln_pre_g"].reshape(1, width), ln_pre_b=params["ln_pre_b"].reshape(1, width),
        ln_post_g=params["ln_post_g"].reshape(1, width), ln_post_b=params["ln_post_b"].reshape(1, width),
        proj=params["proj"],
        blocks=[],
    )
    for blk in params["blocks"]:
        qkv_w, qkv_b = blk["qkv_w"], blk["qkv_b"]

        def split_w(i):
            return qkv_w[:, i * width:(i + 1) * width].reshape(width, heads, Dh).transpose(1, 0, 2)

        def split_b(i):
            return qkv_b[i * width:(i + 1) * width].reshape(heads, 1, Dh)

        prep["blocks"].append(dict(
            ln1_g=blk["ln1_g"].reshape(1, width), ln1_b=blk["ln1_b"].reshape(1, width),
            wq=split_w(0), wk=split_w(1), wv=split_w(2),
            bq=split_b(0), bk=split_b(1), bv=split_b(2),
            wo=blk["out_w"].reshape(heads, Dh, width), bo=blk["out_b"].reshape(1, width),
            ln2_g=blk["ln2_g"].reshape(1, width), ln2_b=blk["ln2_b"].reshape(1, width),
            wfc=blk["fc_w"], bfc=blk["fc_b"].reshape(1, -1),
            wcp=blk["cproj_w"], bcp=blk["cproj_b"].reshape(1, -1),
        ))
    return prep


# ---------------------------------------------------------------------------
# Full forward: preprocess (resize; norm folded into conv) + CLIP ViT encode_image.
# ---------------------------------------------------------------------------
def frozen_clip_image_embedder(x, prep, *, resolution=16, patch=8, heads=2):
    B, C, H, W = x.shape
    wh = jnp.asarray(bicubic_matrix(H, resolution))
    ww = jnp.asarray(bicubic_matrix(W, resolution))
    xr = resize_pallas(x, wh, ww)                                 # (B, C, R, R)

    g = resolution // patch
    patches = (xr.reshape(B, C, g, patch, g, patch)
                 .transpose(0, 2, 4, 1, 3, 5)
                 .reshape(B, g * g, C * patch * patch))
    patches = jnp.pad(patches, ((0, 0), (1, 0), (0, 0)))          # row 0 = cls slot

    x_seq = embed_pallas(patches, prep)                           # (B, S, width)
    for blk in prep["blocks"]:
        x_seq = block_pallas(x_seq, blk, heads=heads)
    return head_pallas(x_seq[:, 0, :], prep)                      # (B, out_dim)


if __name__ == "__main__":
    key = jax.random.PRNGKey(0)
    kx, kp = jax.random.split(key)

    B, C, H, W = 2, 3, 32, 32
    x = jax.random.uniform(kx, (B, C, H, W), jnp.float32, minval=-1.0, maxval=1.0)

    params = init_params(kp, width=32, layers=2, heads=2, patch=8,
                         resolution=16, out_dim=16)
    prep = prepare_params(params, heads=2, patch=8)

    fwd = jax.jit(frozen_clip_image_embedder)
    out = fwd(x, prep)
    jax.block_until_ready(out)

    assert out.shape == (2, 16), out.shape
    assert out.dtype == jnp.float32
    assert bool(jnp.all(jnp.isfinite(out)))
    print("KERNEL_OK")
</pallas_src>

<mosaic_0001>
module attributes {stable_mosaic.version = 11 : i64} {
  func.func @_resize_kernel(%arg0: i32, %arg1: memref<1x3x32x32xf32, #tpu.memory_space<vmem>>, %arg2: memref<16x32xf32, #tpu.memory_space<vmem>>, %arg3: memref<16x32xf32, #tpu.memory_space<vmem>>, %arg4: memref<1x3x16x16xf32, #tpu.memory_space<vmem>>) attributes {dimension_semantics = [#tpu.dimension_semantics<parallel>], iteration_bounds = array<i64: 2>, scalar_prefetch = 0 : i64, scratch_operands = 0 : i64, tpu.core_type = #tpu.core_type<tc>, window_params = [{transform_indices = @transform_0, window_bounds = array<i64: 1, 3, 32, 32>}, {pipeline_mode = #tpu.pipeline_mode<synchronous>, transform_indices = @transform_1, window_bounds = array<i64: 16, 32>}, {pipeline_mode = #tpu.pipeline_mode<synchronous>, transform_indices = @transform_2, window_bounds = array<i64: 16, 32>}, {transform_indices = @transform_3, window_bounds = array<i64: 1, 3, 16, 16>}]} {
    %c0 = arith.constant 0 : index
    %c0_0 = arith.constant 0 : index
    %0 = vector.load %arg2[%c0, %c0_0] : memref<16x32xf32, #tpu.memory_space<vmem>>, vector<16x32xf32>
    %1 = arith.truncf %0 : vector<16x32xf32> to vector<16x32xbf16>
    %c0_1 = arith.constant 0 : index
    %c0_2 = arith.constant 0 : index
    %2 = vector.load %arg3[%c0_1, %c0_2] : memref<16x32xf32, #tpu.memory_space<vmem>>, vector<16x32xf32>
    %3 = arith.truncf %2 : vector<16x32xf32> to vector<16x32xbf16>
    %c0_3 = arith.constant 0 : index
    %c0_4 = arith.constant 0 : index
    %c0_5 = arith.constant 0 : index
    %c0_6 = arith.constant 0 : index
    %4 = vector.load %arg1[%c0_3, %c0_4, %c0_5, %c0_6] : memref<1x3x32x32xf32, #tpu.memory_space<vmem>>, vector<1x1x32x32xf32>
    %5 = vector.shape_cast %4 : vector<1x1x32x32xf32> to vector<32x32xf32>
    %6 = arith.truncf %5 : vector<32x32xf32> to vector<32x32xbf16>
    %cst = arith.constant dense<0.000000e+00> : vector<16x32xf32>
    %7 = tpu.matmul %1, %6, %cst {dimension_numbers = #tpu.dot_dimension_numbers<[1], [0], [0], [1], [0, 0, 1, 1], [], []>} : vector<16x32xbf16>, vector<32x32xbf16>, vector<16x32xf32> -> vector<16x32xf32>
    %8 = arith.truncf %7 : vector<16x32xf32> to vector<16x32xbf16>
    %cst_7 = arith.constant dense<0.000000e+00> : vector<16x16xf32>
    %9 = tpu.matmul %8, %3, %cst_7 {dimension_numbers = #tpu.dot_dimension_numbers<[1], [1], [0], [0], [0, 0, 1, 0], [], []>} : vector<16x32xbf16>, vector<16x32xbf16>, vector<16x16xf32> -> vector<16x16xf32>
    %c0_8 = arith.constant 0 : index
    %c0_9 = arith.constant 0 : index
    %c0_10 = arith.constant 0 : index
    %c0_11 = arith.constant 0 : index
    %10 = vector.load %arg4[%c0_8, %c0_9, %c0_10, %c0_11] : memref<1x3x16x16xf32, #tpu.memory_space<vmem>>, vector<1x1x16x16xf32>
    %11 = vector.shape_cast %10 : vector<1x1x16x16xf32> to vector<16x16xf32>
    %12 = vector.shape_cast %9 : vector<16x16xf32> to vector<1x1x16x16xf32>
    tpu.vector_store %arg4[%c0_8, %c0_9, %c0_10, %c0_11], %12 {strides = array<i32>} : memref<1x3x16x16xf32, #tpu.memory_space<vmem>>, vector<1x1x16x16xf32>,
    %c0_12 = arith.constant 0 : index
    %c1 = arith.constant 1 : index
    %c0_13 = arith.constant 0 : index
    %c0_14 = arith.constant 0 : index
    %13 = vector.load %arg1[%c0_12, %c1, %c0_13, %c0_14] : memref<1x3x32x32xf32, #tpu.memory_space<vmem>>, vector<1x1x32x32xf32>
    %14 = vector.shape_cast %13 : vector<1x1x32x32xf32> to vector<32x32xf32>
    %15 = arith.truncf %14 : vector<32x32xf32> to vector<32x32xbf16>
    %cst_15 = arith.constant dense<0.000000e+00> : vector<16x32xf32>
    %16 = tpu.matmul %1, %15, %cst_15 {dimension_numbers = #tpu.dot_dimension_numbers<[1], [0], [0], [1], [0, 0, 1, 1], [], []>} : vector<16x32xbf16>, vector<32x32xbf16>, vector<16x32xf32> -> vector<16x32xf32>
    %17 = arith.truncf %16 : vector<16x32xf32> to vector<16x32xbf16>
    %cst_16 = arith.constant dense<0.000000e+00> : vector<16x16xf32>
    %18 = tpu.matmul %17, %3, %cst_16 {dimension_numbers = #tpu.dot_dimension_numbers<[1], [1], [0], [0], [0, 0, 1, 0], [], []>} : vector<16x32xbf16>, vector<16x32xbf16>, vector<16x16xf32> -> vector<16x16xf32>
    %c0_17 = arith.constant 0 : index
    %c1_18 = arith.constant 1 : index
    %c0_19 = arith.constant 0 : index
    %c0_20 = arith.constant 0 : index
    %19 = vector.load %arg4[%c0_17, %c1_18, %c0_19, %c0_20] : memref<1x3x16x16xf32, #tpu.memory_space<vmem>>, vector<1x1x16x16xf32>
    %20 = vector.shape_cast %19 : vector<1x1x16x16xf32> to vector<16x16xf32>
    %21 = vector.shape_cast %18 : vector<16x16xf32> to vector<1x1x16x16xf32>
    tpu.vector_store %arg4[%c0_17, %c1_18, %c0_19, %c0_20], %21 {strides = array<i32>} : memref<1x3x16x16xf32, #tpu.memory_space<vmem>>, vector<1x1x16x16xf32>,
    %c0_21 = arith.constant 0 : index
    %c2 = arith.constant 2 : index
    %c0_22 = arith.constant 0 : index
    %c0_23 = arith.constant 0 : index
    %22 = vector.load %arg1[%c0_21, %c2, %c0_22, %c0_23] : memref<1x3x32x32xf32, #tpu.memory_space<vmem>>, vector<1x1x32x32xf32>
    %23 = vector.shape_cast %22 : vector<1x1x32x32xf32> to vector<32x32xf32>
    %24 = arith.truncf %23 : vector<32x32xf32> to vector<32x32xbf16>
    %cst_24 = arith.constant dense<0.000000e+00> : vector<16x32xf32>
    %25 = tpu.matmul %1, %24, %cst_24 {dimension_numbers = #tpu.dot_dimension_numbers<[1], [0], [0], [1], [0, 0, 1, 1], [], []>} : vector<16x32xbf16>, vector<32x32xbf16>, vector<16x32xf32> -> vector<16x32xf32>
    %26 = arith.truncf %25 : vector<16x32xf32> to vector<16x32xbf16>
    %cst_25 = arith.constant dense<0.000000e+00> : vector<16x16xf32>
    %27 = tpu.matmul %26, %3, %cst_25 {dimension_numbers = #tpu.dot_dimension_numbers<[1], [1], [0], [0], [0, 0, 1, 0], [], []>} : vector<16x32xbf16>, vector<16x32xbf16>, vector<16x16xf32> -> vector<16x16xf32>
    %c0_26 = arith.constant 0 : index
    %c2_27 = arith.constant 2 : index
    %c0_28 = arith.constant 0 : index
    %c0_29 = arith.constant 0 : index
    %28 = vector.load %arg4[%c0_26, %c2_27, %c0_28, %c0_29] : memref<1x3x16x16xf32, #tpu.memory_space<vmem>>, vector<1x1x16x16xf32>
    %29 = vector.shape_cast %28 : vector<1x1x16x16xf32> to vector<16x16xf32>
    %30 = vector.shape_cast %27 : vector<16x16xf32> to vector<1x1x16x16xf32>
    tpu.vector_store %arg4[%c0_26, %c2_27, %c0_28, %c0_29], %30 {strides = array<i32>} : memref<1x3x16x16xf32, #tpu.memory_space<vmem>>, vector<1x1x16x16xf32>,
    return
  }
  func.func @transform_0(%arg0: i32) -> (i32, i32, i32, i32) {
    %c0_i32 = arith.constant 0 : i32
    %c0_i32_0 = arith.constant 0 : i32
    %c0_i32_1 = arith.constant 0 : i32
    %c0_i32_2 = arith.constant 0 : i32
    return %arg0, %c0_i32, %c0_i32_0, %c0_i32_1 : i32, i32, i32, i32
  }
  func.func @transform_1(%arg0: i32) -> (i32, i32) {
    %c0_i32 = arith.constant 0 : i32
    %c0_i32_0 = arith.constant 0 : i32
    %c0_i32_1 = arith.constant 0 : i32
    return %c0_i32, %c0_i32_0 : i32, i32
  }
  func.func @transform_2(%arg0: i32) -> (i32, i32) {
    %c0_i32 = arith.constant 0 : i32
    %c0_i32_0 = arith.constant 0 : i32
    %c0_i32_1 = arith.constant 0 : i32
    return %c0_i32, %c0_i32_0 : i32, i32
  }
  func.func @transform_3(%arg0: i32) -> (i32, i32, i32, i32) {
    %c0_i32 = arith.constant 0 : i32
    %c0_i32_0 = arith.constant 0 : i32
    %c0_i32_1 = arith.constant 0 : i32
    %c0_i32_2 = arith.constant 0 : i32
    return %arg0, %c0_i32, %c0_i32_0, %c0_i32_1 : i32, i32, i32, i32
  }
}

module attributes {stable_mosaic.version = 11 : i64} {
  func.func @_embed_kernel(%arg0: i32, %arg1: memref<1x5x192xf32, #tpu.memory_space<vmem>>, %arg2: memref<192x32xf32, #tpu.memory_space<vmem>>, %arg3: memref<5x32xf32, #tpu.memory_space<vmem>>, %arg4: memref<1x32xf32, #tpu.memory_space<vmem>>, %arg5: memref<1x32xf32, #tpu.memory_space<vmem>>, %arg6: memref<1x5x32xf32, #tpu.memory_space<vmem>>) attributes {dimension_semantics = [#tpu.dimension_semantics<parallel>], iteration_bounds = array<i64: 2>, scalar_prefetch = 0 : i64, scratch_operands = 0 : i64, tpu.core_type = #tpu.core_type<tc>, window_params = [{transform_indices = @transform_0, window_bounds = array<i64: 1, 5, 192>}, {pipeline_mode = #tpu.pipeline_mode<synchronous>, transform_indices = @transform_1, window_bounds = array<i64: 192, 32>}, {pipeline_mode = #tpu.pipeline_mode<synchronous>, transform_indices = @transform_2, window_bounds = array<i64: 5, 32>}, {pipeline_mode = #tpu.pipeline_mode<synchronous>, transform_indices = @transform_3, window_bounds = array<i64: 1, 32>}, {pipeline_mode = #tpu.pipeline_mode<synchronous>, transform_indices = @transform_4, window_bounds = array<i64: 1, 32>}, {transform_indices = @transform_5, window_bounds = array<i64: 1, 5, 32>}]} {
    %c0 = arith.constant 0 : index
    %c0_0 = arith.constant 0 : index
    %c0_1 = arith.constant 0 : index
    %0 = vector.load %arg1[%c0, %c0_0, %c0_1] : memref<1x5x192xf32, #tpu.memory_space<vmem>>, vector<1x5x192xf32>
    %1 = vector.shape_cast %0 : vector<1x5x192xf32> to vector<5x192xf32>
    %2 = arith.truncf %1 : vector<5x192xf32> to vector<5x192xbf16>
    %c0_2 = arith.constant 0 : index
    %c0_3 = arith.constant 0 : index
    %3 = vector.load %arg2[%c0_2, %c0_3] : memref<192x32xf32, #tpu.memory_space<vmem>>, vector<192x32xf32>
    %4 = arith.truncf %3 : vector<192x32xf32> to vector<192x32xbf16>
    %cst = arith.constant dense<0.000000e+00> : vector<5x32xf32>
    %5 = tpu.matmul %2, %4, %cst {dimension_numbers = #tpu.dot_dimension_numbers<[1], [0], [0], [1], [0, 0, 1, 1], [], []>} : vector<5x192xbf16>, vector<192x32xbf16>, vector<5x32xf32> -> vector<5x32xf32>
    %c0_4 = arith.constant 0 : index
    %c0_5 = arith.constant 0 : index
    %6 = vector.load %arg3[%c0_4, %c0_5] : memref<5x32xf32, #tpu.memory_space<vmem>>, vector<5x32xf32>
    %7 = arith.addf %5, %6 : vector<5x32xf32>
    %c0_6 = arith.constant 0 : index
    %c0_7 = arith.constant 0 : index
    %8 = vector.load %arg4[%c0_6, %c0_7] : memref<1x32xf32, #tpu.memory_space<vmem>>, vector<1x32xf32>
    %c0_8 = arith.constant 0 : index
    %c0_9 = arith.constant 0 : index
    %9 = vector.load %arg5[%c0_8, %c0_9] : memref<1x32xf32, #tpu.memory_space<vmem>>, vector<1x32xf32>
    %cst_10 = arith.constant dense<0.000000e+00> : vector<5xf32>
    %10 = vector.multi_reduction <add>, %7, %cst_10 [1] : vector<5x32xf32> to vector<5xf32>
    %11 = vector.shape_cast %10 : vector<5xf32> to vector<5x1xf32>
    %cst_11 = arith.constant 3.200000e+01 : f32
    %12 = vector.broadcast %cst_11 : f32 to vector<5x1xf32>
    %13 = arith.divf %11, %12 : vector<5x1xf32>
    %14 = vector.broadcast %13 : vector<5x1xf32> to vector<5x32xf32>
    %15 = arith.subf %7, %14 : vector<5x32xf32>
    %16 = arith.mulf %15, %15 : vector<5x32xf32>
    %cst_12 = arith.constant dense<0.000000e+00> : vector<5xf32>
    %17 = vector.multi_reduction <add>, %16, %cst_12 [1] : vector<5x32xf32> to vector<5xf32>
    %18 = vector.shape_cast %17 : vector<5xf32> to vector<5x1xf32>
    %cst_13 = arith.constant 3.200000e+01 : f32
    %19 = vector.broadcast %cst_13 : f32 to vector<5x1xf32>
    %20 = arith.divf %18, %19 : vector<5x1xf32>
    %cst_14 = arith.constant 9.99999974E-6 : f32
    %21 = vector.broadcast %cst_14 : f32 to vector<5x1xf32>
    %22 = arith.addf %20, %21 : vector<5x1xf32>
    %23 = math.rsqrt %22 : vector<5x1xf32>
    %24 = vector.broadcast %23 : vector<5x1xf32> to vector<5x32xf32>
    %25 = arith.mulf %15, %24 : vector<5x32xf32>
    %26 = vector.broadcast %8 : vector<1x32xf32> to vector<5x32xf32>
    %27 = arith.mulf %25, %26 : vector<5x32xf32>
    %28 = vector.broadcast %9 : vector<1x32xf32> to vector<5x32xf32>
    %29 = arith.addf %27, %28 : vector<5x32xf32>
    %c0_15 = arith.constant 0 : index
    %c0_16 = arith.constant 0 : index
    %c0_17 = arith.constant 0 : index
    %30 = vector.load %arg6[%c0_15, %c0_16, %c0_17] : memref<1x5x32xf32, #tpu.memory_space<vmem>>, vector<1x5x32xf32>
    %31 = vector.shape_cast %30 : vector<1x5x32xf32> to vector<5x32xf32>
    %32 = vector.shape_cast %29 : vector<5x32xf32> to vector<1x5x32xf32>
    tpu.vector_store %arg6[%c0_15, %c0_16, %c0_17], %32 {strides = array<i32>} : memref<1x5x32xf32, #tpu.memory_space<vmem>>, vector<1x5x32xf32>,
    return
  }
  func.func @transform_0(%arg0: i32) -> (i32, i32, i32) {
    %c0_i32 = arith.constant 0 : i32
    %c0_i32_0 = arith.constant 0 : i32
    %c0_i32_1 = arith.constant 0 : i32
    return %arg0, %c0_i32, %c0_i32_0 : i32, i32, i32
  }
  func.func @transform_1(%arg0: i32) -> (i32, i32) {
    %c0_i32 = arith.constant 0 : i32
    %c0_i32_0 = arith.constant 0 : i32
    %c0_i32_1 = arith.constant 0 : i32
    return %c0_i32, %c0_i32_0 : i32, i32
  }
  func.func @transform_2(%arg0: i32) -> (i32, i32) {
    %c0_i32 = arith.constant 0 : i32
    %c0_i32_0 = arith.constant 0 : i32
    %c0_i32_1 = arith.constant 0 : i32
    return %c0_i32, %c0_i32_0 : i32, i32
  }
  func.func @transform_3(%arg0: i32) -> (i32, i32) {
    %c0_i32 = arith.constant 0 : i32
    %c0_i32_0 = arith.constant 0 : i32
    %c0_i32_1 = arith.constant 0 : i32
    return %c0_i32, %c0_i32_0 : i32, i32
  }
  func.func @transform_4(%arg0: i32) -> (i32, i32) {
    %c0_i32 = arith.constant 0 : i32
    %c0_i32_0 = arith.constant 0 : i32
    %c0_i32_1 = arith.constant 0 : i32
    return %c0_i32, %c0_i32_0 : i32, i32
  }
  func.func @transform_5(%arg0: i32) -> (i32, i32, i32) {
    %c0_i32 = arith.constant 0 : i32
    %c0_i32_0 = arith.constant 0 : i32
    %c0_i32_1 = arith.constant 0 : i32
    return %arg0, %c0_i32, %c0_i32_0 : i32, i32, i32
  }
}

module attributes {stable_mosaic.version = 11 : i64} {
  func.func @_block_kernel(%arg0: i32, %arg1: memref<1x5x32xf32, #tpu.memory_space<vmem>>, %arg2: memref<1x32xf32, #tpu.memory_space<vmem>>, %arg3: memref<1x32xf32, #tpu.memory_space<vmem>>, %arg4: memref<2x32x16xf32, #tpu.memory_space<vmem>>, %arg5: memref<2x1x16xf32, #tpu.memory_space<vmem>>, %arg6: memref<2x32x16xf32, #tpu.memory_space<vmem>>, %arg7: memref<2x1x16xf32, #tpu.memory_space<vmem>>, %arg8: memref<2x32x16xf32, #tpu.memory_space<vmem>>, %arg9: memref<2x1x16xf32, #tpu.memory_space<vmem>>, %arg10: memref<2x16x32xf32, #tpu.memory_space<vmem>>, %arg11: memref<1x32xf32, #tpu.memory_space<vmem>>, %arg12: memref<1x32xf32, #tpu.memory_space<vmem>>, %arg13: memref<1x32xf32, #tpu.memory_space<vmem>>, %arg14: memref<32x128xf32, #tpu.memory_space<vmem>>, %arg15: memref<1x128xf32, #tpu.memory_space<vmem>>, %arg16: memref<128x32xf32, #tpu.memory_space<vmem>>, %arg17: memref<1x32xf32, #tpu.memory_space<vmem>>, %arg18: memref<1x5x32xf32, #tpu.memory_space<vmem>>) attributes {dimension_semantics = [#tpu.dimension_semantics<parallel>], iteration_bounds = array<i64: 2>, scalar_prefetch = 0 : i64, scratch_operands = 0 : i64, tpu.core_type = #tpu.core_type<tc>, window_params = [{transform_indices = @transform_0, window_bounds = array<i64: 1, 5, 32>}, {pipeline_mode = #tpu.pipeline_mode<synchronous>, transform_indices = @transform_1, window_bounds = array<i64: 1, 32>}, {pipeline_mode = #tpu.pipeline_mode<synchronous>, transform_indices = @transform_2, window_bounds = array<i64: 1, 32>}, {pipeline_mode = #tpu.pipeline_mode<synchronous>, transform_indices = @transform_3, window_bounds = array<i64: 2, 32, 16>}, {pipeline_mode = #tpu.pipeline_mode<synchronous>, transform_indices = @transform_4, window_bounds = array<i64: 2, 1, 16>}, {pipeline_mode = #tpu.pipeline_mode<synchronous>, transform_indices = @transform_5, window_bounds = array<i64: 2, 32, 16>}, {pipeline_mode = #tpu.pipeline_mode<synchronous>, transform_indices = @transform_6, window_bounds = array<i64: 2, 1, 16>}, {pipeline_mode = #tpu.pipeline_mode<synchronous>, transform_indices = @transform_7, window_bounds = array<i64: 2, 32, 16>}, {pipeline_mode = #tpu.pipeline_mode<synchronous>, transform_indices = @transform_8, window_bounds = array<i64: 2, 1, 16>}, {pipeline_mode = #tpu.pipeline_mode<synchronous>, transform_indices = @transform_9, window_bounds = array<i64: 2, 16, 32>}, {pipeline_mode = #tpu.pipeline_mode<synchronous>, transform_indices = @transform_10, window_bounds = array<i64: 1, 32>}, {pipeline_mode = #tpu.pipeline_mode<synchronous>, transform_indices = @transform_11, window_bounds = array<i64: 1, 32>}, {pipeline_mode = #tpu.pipeline_mode<synchronous>, transform_indices = @transform_12, window_bounds = array<i64: 1, 32>}, {pipeline_mode = #tpu.pipeline_mode<synchronous>, transform_indices = @transform_13, window_bounds = array<i64: 32, 128>}, {pipeline_mode = #tpu.pipeline_mode<synchronous>, transform_indices = @transform_14, window_bounds = array<i64: 1, 128>}, {pipeline_mode = #tpu.pipeline_mode<synchronous>, transform_indices = @transform_15, window_bounds = array<i64: 128, 32>}, {pipeline_mode = #tpu.pipeline_mode<synchronous>, transform_indices = @transform_16, window_bounds = array<i64: 1, 32>}, {transform_indices = @transform_17, window_bounds = array<i64: 1, 5, 32>}]} {
    %c0 = arith.constant 0 : index
    %c0_0 = arith.constant 0 : index
    %c0_1 = arith.constant 0 : index
    %0 = vector.load %arg1[%c0, %c0_0, %c0_1] : memref<1x5x32xf32, #tpu.memory_space<vmem>>, vector<1x5x32xf32>
    %1 = vector.shape_cast %0 : vector<1x5x32xf32> to vector<5x32xf32>
    %c0_2 = arith.constant 0 : index
    %c0_3 = arith.constant 0 : index
    %2 = vector.load %arg2[%c0_2, %c0_3] : memref<1x32xf32, #tpu.memory_space<vmem>>, vector<1x32xf32>
    %c0_4 = arith.constant 0 : index
    %c0_5 = arith.constant 0 : index
    %3 = vector.load %arg3[%c0_4, %c0_5] : memref<1x32xf32, #tpu.memory_space<vmem>>, vector<1x32xf32>
    %cst = arith.constant dense<0.000000e+00> : vector<5xf32>
    %4 = vector.multi_reduction <add>, %1, %cst [1] : vector<5x32xf32> to vector<5xf32>
    %5 = vector.shape_cast %4 : vector<5xf32> to vector<5x1xf32>
    %cst_6 = arith.constant 3.200000e+01 : f32
    %6 = vector.broadcast %cst_6 : f32 to vector<5x1xf32>
    %7 = arith.divf %5, %6 : vector<5x1xf32>
    %8 = vector.broadcast %7 : vector<5x1xf32> to vector<5x32xf32>
    %9 = arith.subf %1, %8 : vector<5x32xf32>
    %10 = arith.mulf %9, %9 : vector<5x32xf32>
    %cst_7 = arith.constant dense<0.000000e+00> : vector<5xf32>
    %11 = vector.multi_reduction <add>, %10, %cst_7 [1] : vector<5x32xf32> to vector<5xf32>
    %12 = vector.shape_cast %11 : vector<5xf32> to vector<5x1xf32>
    %cst_8 = arith.constant 3.200000e+01 : f32
    %13 = vector.broadcast %cst_8 : f32 to vector<5x1xf32>
    %14 = arith.divf %12, %13 : vector<5x1xf32>
    %cst_9 = arith.constant 9.99999974E-6 : f32
    %15 = vector.broadcast %cst_9 : f32 to vector<5x1xf32>
    %16 = arith.addf %14, %15 : vector<5x1xf32>
    %17 = math.rsqrt %16 : vector<5x1xf32>
    %18 = vector.broadcast %17 : vector<5x1xf32> to vector<5x32xf32>
    %19 = arith.mulf %9, %18 : vector<5x32xf32>
    %20 = vector.broadcast %2 : vector<1x32xf32> to vector<5x32xf32>
    %21 = arith.mulf %19, %20 : vector<5x32xf32>
    %22 = vector.broadcast %3 : vector<1x32xf32> to vector<5x32xf32>
    %23 = arith.addf %21, %22 : vector<5x32xf32>
    %24 = arith.truncf %23 : vector<5x32xf32> to vector<5x32xbf16>
    %c0_10 = arith.constant 0 : index
    %c0_11 = arith.constant 0 : index
    %c0_12 = arith.constant 0 : index
    %25 = vector.load %arg4[%c0_10, %c0_11, %c0_12] : memref<2x32x16xf32, #tpu.memory_space<vmem>>, vector<1x32x16xf32>
    %26 = vector.shape_cast %25 : vector<1x32x16xf32> to vector<32x16xf32>
    %27 = arith.truncf %26 : vector<32x16xf32> to vector<32x16xbf16>
    %cst_13 = arith.constant dense<0.000000e+00> : vector<5x16xf32>
    %28 = tpu.matmul %24, %27, %cst_13 {dimension_numbers = #tpu.dot_dimension_numbers<[1], [0], [0], [1], [0, 0, 1, 1], [], []>} : vector<5x32xbf16>, vector<32x16xbf16>, vector<5x16xf32> -> vector<5x16xf32>
    %c0_14 = arith.constant 0 : index
    %c0_15 = arith.constant 0 : index
    %c0_16 = arith.constant 0 : index
    %29 = vector.load %arg5[%c0_14, %c0_15, %c0_16] : memref<2x1x16xf32, #tpu.memory_space<vmem>>, vector<1x1x16xf32>
    %30 = vector.shape_cast %29 : vector<1x1x16xf32> to vector<1x16xf32>
    %31 = vector.broadcast %30 : vector<1x16xf32> to vector<5x16xf32>
    %32 = arith.addf %28, %31 : vector<5x16xf32>
    %c0_17 = arith.constant 0 : index
    %c0_18 = arith.constant 0 : index
    %c0_19 = arith.constant 0 : index
    %33 = vector.load %arg6[%c0_17, %c0_18, %c0_19] : memref<2x32x16xf32, #tpu.memory_space<vmem>>, vector<1x32x16xf32>
    %34 = vector.shape_cast %33 : vector<1x32x16xf32> to vector<32x16xf32>
    %35 = arith.truncf %34 : vector<32x16xf32> to vector<32x16xbf16>
    %cst_20 = arith.constant dense<0.000000e+00> : vector<5x16xf32>
    %36 = tpu.matmul %24, %35, %cst_20 {dimension_numbers = #tpu.dot_dimension_numbers<[1], [0], [0], [1], [0, 0, 1, 1], [], []>} : vector<5x32xbf16>, vector<32x16xbf16>, vector<5x16xf32> -> vector<5x16xf32>
    %c0_21 = arith.constant 0 : index
    %c0_22 = arith.constant 0 : index
    %c0_23 = arith.constant 0 : index
    %37 = vector.load %arg7[%c0_21, %c0_22, %c0_23] : memref<2x1x16xf32, #tpu.memory_space<vmem>>, vector<1x1x16xf32>
    %38 = vector.shape_cast %37 : vector<1x1x16xf32> to vector<1x16xf32>
    %39 = vector.broadcast %38 : vector<1x16xf32> to vector<5x16xf32>
    %40 = arith.addf %36, %39 : vector<5x16xf32>
    %c0_24 = arith.constant 0 : index
    %c0_25 = arith.constant 0 : index
    %c0_26 = arith.constant 0 : index
    %41 = vector.load %arg8[%c0_24, %c0_25, %c0_26] : memref<2x32x16xf32, #tpu.memory_space<vmem>>, vector<1x32x16xf32>
    %42 = vector.shape_cast %41 : vector<1x32x16xf32> to vector<32x16xf32>
    %43 = arith.truncf %42 : vector<32x16xf32> to vector<32x16xbf16>
    %cst_27 = arith.constant dense<0.000000e+00> : vector<5x16xf32>
    %44 = tpu.matmul %24, %43, %cst_27 {dimension_numbers = #tpu.dot_dimension_numbers<[1], [0], [0], [1], [0, 0, 1, 1], [], []>} : vector<5x32xbf16>, vector<32x16xbf16>, vector<5x16xf32> -> vector<5x16xf32>
    %c0_28 = arith.constant 0 : index
    %c0_29 = arith.constant 0 : index
    %c0_30 = arith.constant 0 : index
    %45 = vector.load %arg9[%c0_28, %c0_29, %c0_30] : memref<2x1x16xf32, #tpu.memory_space<vmem>>, vector<1x1x16xf32>
    %46 = vector.shape_cast %45 : vector<1x1x16xf32> to vector<1x16xf32>
    %47 = vector.broadcast %46 : vector<1x16xf32> to vector<5x16xf32>
    %48 = arith.addf %44, %47 : vector<5x16xf32>
    %49 = arith.truncf %32 : vector<5x16xf32> to vector<5x16xbf16>
    %50 = arith.truncf %40 : vector<5x16xf32> to vector<5x16xbf16>
    %cst_31 = arith.constant dense<0.000000e+00> : vector<5x5xf32>
    %51 = tpu.matmul %49, %50, %cst_31 {dimension_numbers = #tpu.dot_dimension_numbers<[1], [1], [0], [0], [0, 0, 1, 0], [], []>} : vector<5x16xbf16>, vector<5x16xbf16>, vector<5x5xf32> -> vector<5x5xf32>
    %cst_32 = arith.constant 2.500000e-01 : f32
    %52 = vector.broadcast %cst_32 : f32 to vector<5x5xf32>
    %53 = arith.mulf %51, %52 : vector<5x5xf32>
    %cst_33 = arith.constant dense<0xFF800000> : vector<5xf32>
    %54 = vector.multi_reduction <maximumf>, %53, %cst_33 [1] : vector<5x5xf32> to vector<5xf32>
    %55 = vector.shape_cast %54 : vector<5xf32> to vector<5x1xf32>
    %56 = vector.broadcast %55 : vector<5x1xf32> to vector<5x5xf32>
    %57 = arith.subf %53, %56 : vector<5x5xf32>
    %58 = math.exp %57 : vector<5x5xf32>
    %cst_34 = arith.constant dense<0.000000e+00> : vector<5xf32>
    %59 = vector.multi_reduction <add>, %58, %cst_34 [1] : vector<5x5xf32> to vector<5xf32>
    %60 = vector.shape_cast %59 : vector<5xf32> to vector<5x1xf32>
    %61 = tpu.reciprocal %60 {approx = true} : vector<5x1xf32> -> vector<5x1xf32>
    %62 = vector.broadcast %61 : vector<5x1xf32> to vector<5x5xf32>
    %63 = arith.mulf %58, %62 : vector<5x5xf32>
    %64 = arith.truncf %63 : vector<5x5xf32> to vector<5x5xbf16>
    %65 = arith.truncf %48 : vector<5x16xf32> to vector<5x16xbf16>
    %cst_35 = arith.constant dense<0.000000e+00> : vector<5x16xf32>
    %66 = tpu.matmul %64, %65, %cst_35 {dimension_numbers = #tpu.dot_dimension_numbers<[1], [0], [0], [1], [0, 0, 1, 1], [], []>} : vector<5x5xbf16>, vector<5x16xbf16>, vector<5x16xf32> -> vector<5x16xf32>
    %67 = arith.truncf %66 : vector<5x16xf32> to vector<5x16xbf16>
    %c0_36 = arith.constant 0 : index
    %c0_37 = arith.constant 0 : index
    %c0_38 = arith.constant 0 : index
    %68 = vector.load %arg10[%c0_36, %c0_37, %c0_38] : memref<2x16x32xf32, #tpu.memory_space<vmem>>, vector<1x16x32xf32>
    %69 = vector.shape_cast %68 : vector<1x16x32xf32> to vector<16x32xf32>
    %70 = arith.truncf %69 : vector<16x32xf32> to vector<16x32xbf16>
    %cst_39 = arith.constant dense<0.000000e+00> : vector<5x32xf32>
    %71 = tpu.matmul %67, %70, %cst_39 {dimension_numbers = #tpu.dot_dimension_numbers<[1], [0], [0], [1], [0, 0, 1, 1], [], []>} : vector<5x16xbf16>, vector<16x32xbf16>, vector<5x32xf32> -> vector<5x32xf32>
    %c1 = arith.constant 1 : index
    %c0_40 = arith.constant 0 : index
    %c0_41 = arith.constant 0 : index
    %72 = vector.load %arg4[%c1, %c0_40, %c0_41] : memref<2x32x16xf32, #tpu.memory_space<vmem>>, vector<1x32x16xf32>
    %73 = vector.shape_cast %72 : vector<1x32x16xf32> to vector<32x16xf32>
    %74 = arith.truncf %73 : vector<32x16xf32> to vector<32x16xbf16>
    %cst_42 = arith.constant dense<0.000000e+00> : vector<5x16xf32>
    %75 = tpu.matmul %24, %74, %cst_42 {dimension_numbers = #tpu.dot_dimension_numbers<[1], [0], [0], [1], [0, 0, 1, 1], [], []>} : vector<5x32xbf16>, vector<32x16xbf16>, vector<5x16xf32> -> vector<5x16xf32>
    %c1_43 = arith.constant 1 : index
    %c0_44 = arith.constant 0 : index
    %c0_45 = arith.constant 0 : index
    %76 = vector.load %arg5[%c1_43, %c0_44, %c0_45] : memref<2x1x16xf32, #tpu.memory_space<vmem>>, vector<1x1x16xf32>
    %77 = vector.shape_cast %76 : vector<1x1x16xf32> to vector<1x16xf32>
    %78 = vector.broadcast %77 : vector<1x16xf32> to vector<5x16xf32>
    %79 = arith.addf %75, %78 : vector<5x16xf32>
    %c1_46 = arith.constant 1 : index
    %c0_47 = arith.constant 0 : index
    %c0_48 = arith.constant 0 : index
    %80 = vector.load %arg6[%c1_46, %c0_47, %c0_48] : memref<2x32x16xf32, #tpu.memory_space<vmem>>, vector<1x32x16xf32>
    %81 = vector.shape_cast %80 : vector<1x32x16xf32> to vector<32x16xf32>
    %82 = arith.truncf %81 : vector<32x16xf32> to vector<32x16xbf16>
    %cst_49 = arith.constant dense<0.000000e+00> : vector<5x16xf32>
    %83 = tpu.matmul %24, %82, %cst_49 {dimension_numbers = #tpu.dot_dimension_numbers<[1], [0], [0], [1], [0, 0, 1, 1], [], []>} : vector<5x32xbf16>, vector<32x16xbf16>, vector<5x16xf32> -> vector<5x16xf32>
    %c1_50 = arith.constant 1 : index
    %c0_51 = arith.constant 0 : index
    %c0_52 = arith.constant 0 : index
    %84 = vector.load %arg7[%c1_50, %c0_51, %c0_52] : memref<2x1x16xf32, #tpu.memory_space<vmem>>, vector<1x1x16xf32>
    %85 = vector.shape_cast %84 : vector<1x1x16xf32> to vector<1x16xf32>
    %86 = vector.broadcast %85 : vector<1x16xf32> to vector<5x16xf32>
    %87 = arith.addf %83, %86 : vector<5x16xf32>
    %c1_53 = arith.constant 1 : index
    %c0_54 = arith.constant 0 : index
    %c0_55 = arith.constant 0 : index
    %88 = vector.load %arg8[%c1_53, %c0_54, %c0_55] : memref<2x32x16xf32, #tpu.memory_space<vmem>>, vector<1x32x16xf32>
    %89 = vector.shape_cast %88 : vector<1x32x16xf32> to vector<32x16xf32>
    %90 = arith.truncf %89 : vector<32x16xf32> to vector<32x16xbf16>
    %cst_56 = arith.constant dense<0.000000e+00> : vector<5x16xf32>
    %91 = tpu.matmul %24, %90, %cst_56 {dimension_numbers = #tpu.dot_dimension_numbers<[1], [0], [0], [1], [0, 0, 1, 1], [], []>} : vector<5x32xbf16>, vector<32x16xbf16>, vector<5x16xf32> -> vector<5x16xf32>
    %c1_57 = arith.constant 1 : index
    %c0_58 = arith.constant 0 : index
    %c0_59 = arith.constant 0 : index
    %92 = vector.load %arg9[%c1_57, %c0_58, %c0_59] : memref<2x1x16xf32, #tpu.memory_space<vmem>>, vector<1x1x16xf32>
    %93 = vector.shape_cast %92 : vector<1x1x16xf32> to vector<1x16xf32>
    %94 = vector.broadcast %93 : vector<1x16xf32> to vector<5x16xf32>
    %95 = arith.addf %91, %94 : vector<5x16xf32>
    %96 = arith.truncf %79 : vector<5x16xf32> to vector<5x16xbf16>
    %97 = arith.truncf %87 : vector<5x16xf32> to vector<5x16xbf16>
    %cst_60 = arith.constant dense<0.000000e+00> : vector<5x5xf32>
    %98 = tpu.matmul %96, %97, %cst_60 {dimension_numbers = #tpu.dot_dimension_numbers<[1], [1], [0], [0], [0, 0, 1, 0], [], []>} : vector<5x16xbf16>, vector<5x16xbf16>, vector<5x5xf32> -> vector<5x5xf32>
    %cst_61 = arith.constant 2.500000e-01 : f32
    %99 = vector.broadcast %cst_61 : f32 to vector<5x5xf32>
    %100 = arith.mulf %98, %99 : vector<5x5xf32>
    %cst_62 = arith.constant dense<0xFF800000> : vector<5xf32>
    %101 = vector.multi_reduction <maximumf>, %100, %cst_62 [1] : vector<5x5xf32> to vector<5xf32>
    %102 = vector.shape_cast %101 : vector<5xf32> to vector<5x1xf32>
    %103 = vector.broadcast %102 : vector<5x1xf32> to vector<5x5xf32>
    %104 = arith.subf %100, %103 : vector<5x5xf32>
    %105 = math.exp %104 : vector<5x5xf32>
    %cst_63 = arith.constant dense<0.000000e+00> : vector<5xf32>
    %106 = vector.multi_reduction <add>, %105, %cst_63 [1] : vector<5x5xf32> to vector<5xf32>
    %107 = vector.shape_cast %106 : vector<5xf32> to vector<5x1xf32>
    %108 = tpu.reciprocal %107 {approx = true} : vector<5x1xf32> -> vector<5x1xf32>
    %109 = vector.broadcast %108 : vector<5x1xf32> to vector<5x5xf32>
    %110 = arith.mulf %105, %109 : vector<5x5xf32>
    %111 = arith.truncf %110 : vector<5x5xf32> to vector<5x5xbf16>
    %112 = arith.truncf %95 : vector<5x16xf32> to vector<5x16xbf16>
    %cst_64 = arith.constant dense<0.000000e+00> : vector<5x16xf32>
    %113 = tpu.matmul %111, %112, %cst_64 {dimension_numbers = #tpu.dot_dimension_numbers<[1], [0], [0], [1], [0, 0, 1, 1], [], []>} : vector<5x5xbf16>, vector<5x16xbf16>, vector<5x16xf32> -> vector<5x16xf32>
    %114 = arith.truncf %113 : vector<5x16xf32> to vector<5x16xbf16>
    %c1_65 = arith.constant 1 : index
    %c0_66 = arith.constant 0 : index
    %c0_67 = arith.constant 0 : index
    %115 = vector.load %arg10[%c1_65, %c0_66, %c0_67] : memref<2x16x32xf32, #tpu.memory_space<vmem>>, vector<1x16x32xf32>
    %116 = vector.shape_cast %115 : vector<1x16x32xf32> to vector<16x32xf32>
    %117 = arith.truncf %116 : vector<16x32xf32> to vector<16x32xbf16>
    %cst_68 = arith.constant dense<0.000000e+00> : vector<5x32xf32>
    %118 = tpu.matmul %114, %117, %cst_68 {dimension_numbers = #tpu.dot_dimension_numbers<[1], [0], [0], [1], [0, 0, 1, 1], [], []>} : vector<5x16xbf16>, vector<16x32xbf16>, vector<5x32xf32> -> vector<5x32xf32>
    %119 = arith.addf %71, %118 : vector<5x32xf32>
    %120 = arith.addf %1, %119 : vector<5x32xf32>
    %c0_69 = arith.constant 0 : index
    %c0_70 = arith.constant 0 : index
    %121 = vector.load %arg11[%c0_69, %c0_70] : memref<1x32xf32, #tpu.memory_space<vmem>>, vector<1x32xf32>
    %122 = vector.broadcast %121 : vector<1x32xf32> to vector<5x32xf32>
    %123 = arith.addf %120, %122 : vector<5x32xf32>
    %c0_71 = arith.constant 0 : index
    %c0_72 = arith.constant 0 : index
    %124 = vector.load %arg12[%c0_71, %c0_72] : memref<1x32xf32, #tpu.memory_space<vmem>>, vector<1x32xf32>
    %c0_73 = arith.constant 0 : index
    %c0_74 = arith.constant 0 : index
    %125 = vector.load %arg13[%c0_73, %c0_74] : memref<1x32xf32, #tpu.memory_space<vmem>>, vector<1x32xf32>
    %cst_75 = arith.constant dense<0.000000e+00> : vector<5xf32>
    %126 = vector.multi_reduction <add>, %123, %cst_75 [1] : vector<5x32xf32> to vector<5xf32>
    %127 = vector.shape_cast %126 : vector<5xf32> to vector<5x1xf32>
    %cst_76 = arith.constant 3.200000e+01 : f32
    %128 = vector.broadcast %cst_76 : f32 to vector<5x1xf32>
    %129 = arith.divf %127, %128 : vector<5x1xf32>
    %130 = vector.broadcast %129 : vector<5x1xf32> to vector<5x32xf32>
    %131 = arith.subf %123, %130 : vector<5x32xf32>
    %132 = arith.mulf %131, %131 : vector<5x32xf32>
    %cst_77 = arith.constant dense<0.000000e+00> : vector<5xf32>
    %133 = vector.multi_reduction <add>, %132, %cst_77 [1] : vector<5x32xf32> to vector<5xf32>
    %134 = vector.shape_cast %133 : vector<5xf32> to vector<5x1xf32>
    %cst_78 = arith.constant 3.200000e+01 : f32
    %135 = vector.broadcast %cst_78 : f32 to vector<5x1xf32>
    %136 = arith.divf %134, %135 : vector<5x1xf32>
    %cst_79 = arith.constant 9.99999974E-6 : f32
    %137 = vector.broadcast %cst_79 : f32 to vector<5x1xf32>
    %138 = arith.addf %136, %137 : vector<5x1xf32>
    %139 = math.rsqrt %138 : vector<5x1xf32>
    %140 = vector.broadcast %139 : vector<5x1xf32> to vector<5x32xf32>
    %141 = arith.mulf %131, %140 : vector<5x32xf32>
    %142 = vector.broadcast %124 : vector<1x32xf32> to vector<5x32xf32>
    %143 = arith.mulf %141, %142 : vector<5x32xf32>
    %144 = vector.broadcast %125 : vector<1x32xf32> to vector<5x32xf32>
    %145 = arith.addf %143, %144 : vector<5x32xf32>
    %146 = arith.truncf %145 : vector<5x32xf32> to vector<5x32xbf16>
    %c0_80 = arith.constant 0 : index
    %c0_81 = arith.constant 0 : index
    %147 = vector.load %arg14[%c0_80, %c0_81] : memref<32x128xf32, #tpu.memory_space<vmem>>, vector<32x128xf32>
    %148 = arith.truncf %147 : vector<32x128xf32> to vector<32x128xbf16>
    %cst_82 = arith.constant dense<0.000000e+00> : vector<5x128xf32>
    %149 = tpu.matmul %146, %148, %cst_82 {dimension_numbers = #tpu.dot_dimension_numbers<[1], [0], [0], [1], [0, 0, 1, 1], [], []>} : vector<5x32xbf16>, vector<32x128xbf16>, vector<5x128xf32> -> vector<5x128xf32>
    %c0_83 = arith.constant 0 : index
    %c0_84 = arith.constant 0 : index
    %150 = vector.load %arg15[%c0_83, %c0_84] : memref<1x128xf32, #tpu.memory_space<vmem>>, vector<1x128xf32>
    %151 = vector.broadcast %150 : vector<1x128xf32> to vector<5x128xf32>
    %152 = arith.addf %149, %151 : vector<5x128xf32>
    %cst_85 = arith.constant 1.702000e+00 : f32
    %153 = vector.broadcast %cst_85 : f32 to vector<5x128xf32>
    %154 = arith.mulf %153, %152 : vector<5x128xf32>
    %155 = arith.negf %154 : vector<5x128xf32>
    %156 = math.exp %155 : vector<5x128xf32>
    %cst_86 = arith.constant 1.000000e+00 : f32
    %157 = vector.broadcast %cst_86 : f32 to vector<5x128xf32>
    %158 = arith.addf %157, %156 : vector<5x128xf32>
    %159 = arith.divf %157, %158 : vector<5x128xf32>
    %160 = arith.mulf %152, %159 : vector<5x128xf32>
    %161 = arith.truncf %160 : vector<5x128xf32> to vector<5x128xbf16>
    %c0_87 = arith.constant 0 : index
    %c0_88 = arith.constant 0 : index
    %162 = vector.load %arg16[%c0_87, %c0_88] : memref<128x32xf32, #tpu.memory_space<vmem>>, vector<128x32xf32>
    %163 = arith.truncf %162 : vector<128x32xf32> to vector<128x32xbf16>
    %cst_89 = arith.constant dense<0.000000e+00> : vector<5x32xf32>
    %164 = tpu.matmul %161, %163, %cst_89 {dimension_numbers = #tpu.dot_dimension_numbers<[1], [0], [0], [1], [0, 0, 1, 1], [], []>} : vector<5x128xbf16>, vector<128x32xbf16>, vector<5x32xf32> -> vector<5x32xf32>
    %c0_90 = arith.constant 0 : index
    %c0_91 = arith.constant 0 : index
    %165 = vector.load %arg17[%c0_90, %c0_91] : memref<1x32xf32, #tpu.memory_space<vmem>>, vector<1x32xf32>
    %166 = vector.broadcast %165 : vector<1x32xf32> to vector<5x32xf32>
    %167 = arith.addf %164, %166 : vector<5x32xf32>
    %168 = arith.addf %123, %167 : vector<5x32xf32>
    %c0_92 = arith.constant 0 : index
    %c0_93 = arith.constant 0 : index
    %c0_94 = arith.constant 0 : index
    %169 = vector.load %arg18[%c0_92, %c0_93, %c0_94] : memref<1x5x32xf32, #tpu.memory_space<vmem>>, vector<1x5x32xf32>
    %170 = vector.shape_cast %169 : vector<1x5x32xf32> to vector<5x32xf32>
    %171 = vector.shape_cast %168 : vector<5x32xf32> to vector<1x5x32xf32>
    tpu.vector_store %arg18[%c0_92, %c0_93, %c0_94], %171 {strides = array<i32>} : memref<1x5x32xf32, #tpu.memory_space<vmem>>, vector<1x5x32xf32>,
    return
  }
  func.func @transform_0(%arg0: i32) -> (i32, i32, i32) {
    %c0_i32 = arith.constant 0 : i32
    %c0_i32_0 = arith.constant 0 : i32
    %c0_i32_1 = arith.constant 0 : i32
    return %arg0, %c0_i32, %c0_i32_0 : i32, i32, i32
  }
  func.func @transform_1(%arg0: i32) -> (i32, i32) {
    %c0_i32 = arith.constant 0 : i32
    %c0_i32_0 = arith.constant 0 : i32
    %c0_i32_1 = arith.constant 0 : i32
    return %c0_i32, %c0_i32_0 : i32, i32
  }
  func.func @transform_2(%arg0: i32) -> (i32, i32) {
    %c0_i32 = arith.constant 0 : i32
    %c0_i32_0 = arith.constant 0 : i32
    %c0_i32_1 = arith.constant 0 : i32
    return %c0_i32, %c0_i32_0 : i32, i32
  }
  func.func @transform_3(%arg0: i32) -> (i32, i32, i32) {
    %c0_i32 = arith.constant 0 : i32
    %c0_i32_0 = arith.constant 0 : i32
    %c0_i32_1 = arith.constant 0 : i32
    %c0_i32_2 = arith.constant 0 : i32
    return %c0_i32, %c0_i32_0, %c0_i32_1 : i32, i32, i32
  }
  func.func @transform_4(%arg0: i32) -> (i32, i32, i32) {
    %c0_i32 = arith.constant 0 : i32
    %c0_i32_0 = arith.constant 0 : i32
    %c0_i32_1 = arith.constant 0 : i32
    %c0_i32_2 = arith.constant 0 : i32
    return %c0_i32, %c0_i32_0, %c0_i32_1 : i32, i32, i32
  }
  func.func @transform_5(%arg0: i32) -> (i32, i32, i32) {
    %c0_i32 = arith.constant 0 : i32
    %c0_i32_0 = arith.constant 0 : i32
    %c0_i32_1 = arith.constant 0 : i32
    %c0_i32_2 = arith.constant 0 : i32
    return %c0_i32, %c0_i32_0, %c0_i32_1 : i32, i32, i32
  }
  func.func @transform_6(%arg0: i32) -> (i32, i32, i32) {
    %c0_i32 = arith.constant 0 : i32
    %c0_i32_0 = arith.constant 0 : i32
    %c0_i32_1 = arith.constant 0 : i32
    %c0_i32_2 = arith.constant 0 : i32
    return %c0_i32, %c0_i32_0, %c0_i32_1 : i32, i32, i32
  }
  func.func @transform_7(%arg0: i32) -> (i32, i32, i32) {
    %c0_i32 = arith.constant 0 : i32
    %c0_i32_0 = arith.constant 0 : i32
    %c0_i32_1 = arith.constant 0 : i32
    %c0_i32_2 = arith.constant 0 : i32
    return %c0_i32, %c0_i32_0, %c0_i32_1 : i32, i32, i32
  }
  func.func @transform_8(%arg0: i32) -> (i32, i32, i32) {
    %c0_i32 = arith.constant 0 : i32
    %c0_i32_0 = arith.constant 0 : i32
    %c0_i32_1 = arith.constant 0 : i32
    %c0_i32_2 = arith.constant 0 : i32
    return %c0_i32, %c0_i32_0, %c0_i32_1 : i32, i32, i32
  }
  func.func @transform_9(%arg0: i32) -> (i32, i32, i32) {
    %c0_i32 = arith.constant 0 : i32
    %c0_i32_0 = arith.constant 0 : i32
    %c0_i32_1 = arith.constant 0 : i32
    %c0_i32_2 = arith.constant 0 : i32
    return %c0_i32, %c0_i32_0, %c0_i32_1 : i32, i32, i32
  }
  func.func @transform_10(%arg0: i32) -> (i32, i32) {
    %c0_i32 = arith.constant 0 : i32
    %c0_i32_0 = arith.constant 0 : i32
    %c0_i32_1 = arith.constant 0 : i32
    return %c0_i32, %c0_i32_0 : i32, i32
  }
  func.func @transform_11(%arg0: i32) -> (i32, i32) {
    %c0_i32 = arith.constant 0 : i32
    %c0_i32_0 = arith.constant 0 : i32
    %c0_i32_1 = arith.constant 0 : i32
    return %c0_i32, %c0_i32_0 : i32, i32
  }
  func.func @transform_12(%arg0: i32) -> (i32, i32) {
    %c0_i32 = arith.constant 0 : i32
    %c0_i32_0 = arith.constant 0 : i32
    %c0_i32_1 = arith.constant 0 : i32
    return %c0_i32, %c0_i32_0 : i32, i32
  }
  func.func @transform_13(%arg0: i32) -> (i32, i32) {
    %c0_i32 = arith.constant 0 : i32
    %c0_i32_0 = arith.constant 0 : i32
    %c0_i32_1 = arith.constant 0 : i32
    return %c0_i32, %c0_i32_0 : i32, i32
  }
  func.func @transform_14(%arg0: i32) -> (i32, i32) {
    %c0_i32 = arith.constant 0 : i32
    %c0_i32_0 = arith.constant 0 : i32
    %c0_i32_1 = arith.constant 0 : i32
    return %c0_i32, %c0_i32_0 : i32, i32
  }
  func.func @transform_15(%arg0: i32) -> (i32, i32) {
    %c0_i32 = arith.constant 0 : i32
    %c0_i32_0 = arith.constant 0 : i32
    %c0_i32_1 = arith.constant 0 : i32
    return %c0_i32, %c0_i32_0 : i32, i32
  }
  func.func @transform_16(%arg0: i32) -> (i32, i32) {
    %c0_i32 = arith.constant 0 : i32
    %c0_i32_0 = arith.constant 0 : i32
    %c0_i32_1 = arith.constant 0 : i32
    return %c0_i32, %c0_i32_0 : i32, i32
  }
  func.func @transform_17(%arg0: i32) -> (i32, i32, i32) {
    %c0_i32 = arith.constant 0 : i32
    %c0_i32_0 = arith.constant 0 : i32
    %c0_i32_1 = arith.constant 0 : i32
    return %arg0, %c0_i32, %c0_i32_0 : i32, i32, i32
  }
}

module attributes {stable_mosaic.version = 11 : i64} {
  func.func @_head_kernel(%arg0: memref<2x32xf32, #tpu.memory_space<vmem>>, %arg1: memref<1x32xf32, #tpu.memory_space<vmem>>, %arg2: memref<1x32xf32, #tpu.memory_space<vmem>>, %arg3: memref<32x16xf32, #tpu.memory_space<vmem>>, %arg4: memref<2x16xf32, #tpu.memory_space<vmem>>) attributes {dimension_semantics = [], scalar_prefetch = 0 : i64, scratch_operands = 0 : i64, tpu.core_type = #tpu.core_type<tc>} {
    %c0 = arith.constant 0 : index
    %c0_0 = arith.constant 0 : index
    %0 = vector.load %arg0[%c0, %c0_0] : memref<2x32xf32, #tpu.memory_space<vmem>>, vector<2x32xf32>
    %c0_1 = arith.constant 0 : index
    %c0_2 = arith.constant 0 : index
    %1 = vector.load %arg1[%c0_1, %c0_2] : memref<1x32xf32, #tpu.memory_space<vmem>>, vector<1x32xf32>
    %c0_3 = arith.constant 0 : index
    %c0_4 = arith.constant 0 : index
    %2 = vector.load %arg2[%c0_3, %c0_4] : memref<1x32xf32, #tpu.memory_space<vmem>>, vector<1x32xf32>
    %cst = arith.constant dense<0.000000e+00> : vector<2xf32>
    %3 = vector.multi_reduction <add>, %0, %cst [1] : vector<2x32xf32> to vector<2xf32>
    %4 = vector.shape_cast %3 : vector<2xf32> to vector<2x1xf32>
    %cst_5 = arith.constant 3.200000e+01 : f32
    %5 = vector.broadcast %cst_5 : f32 to vector<2x1xf32>
    %6 = arith.divf %4, %5 : vector<2x1xf32>
    %7 = vector.broadcast %6 : vector<2x1xf32> to vector<2x32xf32>
    %8 = arith.subf %0, %7 : vector<2x32xf32>
    %9 = arith.mulf %8, %8 : vector<2x32xf32>
    %cst_6 = arith.constant dense<0.000000e+00> : vector<2xf32>
    %10 = vector.multi_reduction <add>, %9, %cst_6 [1] : vector<2x32xf32> to vector<2xf32>
    %11 = vector.shape_cast %10 : vector<2xf32> to vector<2x1xf32>
    %cst_7 = arith.constant 3.200000e+01 : f32
    %12 = vector.broadcast %cst_7 : f32 to vector<2x1xf32>
    %13 = arith.divf %11, %12 : vector<2x1xf32>
    %cst_8 = arith.constant 9.99999974E-6 : f32
    %14 = vector.broadcast %cst_8 : f32 to vector<2x1xf32>
    %15 = arith.addf %13, %14 : vector<2x1xf32>
    %16 = math.rsqrt %15 : vector<2x1xf32>
    %17 = vector.broadcast %16 : vector<2x1xf32> to vector<2x32xf32>
    %18 = arith.mulf %8, %17 : vector<2x32xf32>
    %19 = vector.broadcast %1 : vector<1x32xf32> to vector<2x32xf32>
    %20 = arith.mulf %18, %19 : vector<2x32xf32>
    %21 = vector.broadcast %2 : vector<1x32xf32> to vector<2x32xf32>
    %22 = arith.addf %20, %21 : vector<2x32xf32>
    %23 = arith.truncf %22 : vector<2x32xf32> to vector<2x32xbf16>
    %c0_9 = arith.constant 0 : index
    %c0_10 = arith.constant 0 : index
    %24 = vector.load %arg3[%c0_9, %c0_10] : memref<32x16xf32, #tpu.memory_space<vmem>>, vector<32x16xf32>
    %25 = arith.truncf %24 : vector<32x16xf32> to vector<32x16xbf16>
    %cst_11 = arith.constant dense<0.000000e+00> : vector<2x16xf32>
    %26 = tpu.matmul %23, %25, %cst_11 {dimension_numbers = #tpu.dot_dimension_numbers<[1], [0], [0], [1], [0, 0, 1, 1], [], []>} : vector<2x32xbf16>, vector<32x16xbf16>, vector<2x16xf32> -> vector<2x16xf32>
    %c0_12 = arith.constant 0 : index
    %c0_13 = arith.constant 0 : index
    %27 = vector.load %arg4[%c0_12, %c0_13] : memref<2x16xf32, #tpu.memory_space<vmem>>, vector<2x16xf32>
    tpu.vector_store %arg4[%c0_12, %c0_13], %26 {strides = array<i32>} : memref<2x16xf32, #tpu.memory_space<vmem>>, vector<2x16xf32>,
    return
  }
}

</mosaic_0001>

<bundles_post_ra>
// kernel: frozen_clip_image_embedder.5
= control target key start
LH: loop header
LB: loop body
LE: loop exit
PB: predicated region body
PF: predicated region fallthrough
CT: control target
= control target key end

     0   :  { %8 = vsyncpa [#allocation3], 0  ;;  %s663_s0 = inlined_call_operand.hbm [shape: f32[2,3,32,32], index: 0, kind: input, shape index: {}]   ;;  %s664_s1 = inlined_call_operand.vmem [shape: f32[16,32], index: 1, kind: input, shape index: {}, may-alias: {1,2}]   ;;  %s665_s2 = inlined_call_operand.vmem [shape: f32[16,32], index: 2, kind: input, shape index: {}, may-alias: {1,2}]   ;;  %s666_s3 = inlined_call_operand.vmem [shape: f32[2,3,16,16], index: 3, kind: output, shape index: {}]  }
   0x1   :  { %10 = vsyncpa [#allocation3 + $0x1], 0  ;;  %s558_s12 = smov 0   ;;  %s560_s13 = smov 0  }
   0x2   :  { %s562_s14 = smov 0   ;;  %s564_s15 = smov 0  }
   0x3 LB: > { %s577_s16 = sadd.s32 4294967295, %s534_s15   ;;  %s580_s17 = sadd.s32 1, %s534_s15   ;;  %s534_s15 = sphi %s564_s15, %s672_s15   ;;  %s530_s14 = sphi %s562_s14, %s671_s14   ;;  %s526_s13 = sphi %s560_s13, %s670_s13   ;;  %s522_s12 = sphi %s558_s12, %s669_s12  }
   0x4   : > { %s20_s18 = ssub.s32 %s534_s15, %s580_s17  ;;  %s23_s19 = sadd.s32 1, %s530_s14 }
   0x5   : > { %p21_p0 = scmp.eq.s32.totalorder %s20_s18, 0  ;;  %p30_p1 = scmp.ne.s32.totalorder %s530_s14, %s526_s13 }
   0x6   : > { %p31_p2 = scmp.eq.s32.totalorder %s534_s15, 0  ;;  %p36_p3 = scmp.ne.s32.totalorder %s526_s13, %s522_s12 }
   0x7   : > { %s590_s20 = scalar_select %p21_p0, %s530_s14, %s23_s19  }
   0x8   : > { %p32_p4 = por %p31_p2, %p30_p1  ;;  %p37_p5 = scmp.eq.s32.totalorder %s577_s16, 0 }
   0x9   : > { %p435_p6 = scmp.lt.s32.totalorder %s534_s15, 2  ;;  %s134_s22 = sand.u32 1, %s530_s14  }
   0xa   : > { %p594_p7 = por %p37_p5, %p36_p3  ;;  %s425_s23 = smul.u32 96, %s134_s22 }
   0xb   : > { %s426_s24 = smul.u32 96, %s534_s15  ;;  %p600_p8 = pnand %p435_p6, %p32_p4 }
   0xc   : > { %s138_s29 = scalar_lea.vmem [#allocation2], %s425_s23  ;;  %p403_p9 = scmp.ge.s32.totalorder %s534_s15, 1 }
   0xd   : > { %s143_s28 = scalar_lea.hbm %s663_s0, %s426_s24  ;;  %s146_s30 = sshll.u32 %s138_s29, 4  ;;  %s147_s30 = int_to_ptr.vmem [resolvable:$true] %s146_s30 }
   0xe   : > { %s144_s4 = sshll.u32 %s143_s28, 4  ;;  %s135_s5 = scalar_lea.sflag [#allocation3], %s134_s22  ;;  %s145_s4 = int_to_ptr.hbm [resolvable:$true] %s144_s4 }
   0xf   : > { %s470_s6 = sshra.s32 %s145_s4, 4  ;;  %p474_p11 = pneg %p600_p8  ;;  %s471_s6 = int_to_ptr.hbm [resolvable:$true] %s470_s6 }
  0x10   : > { %s472_s7 = scalar_lea.hbm %s471_s6, 96  ;;  %s477_s10 = scalar_lea.hbm %s663_s0, 192 }
  0x11   : > { %p473_p10 = scmp.ne.s32.totalorder %s471_s6, %s472_s7  ;;  %p478_p0 = scmp.lt.s32.totalorder %s471_s6, %s663_s0 }
  0x12   : > { %p479_p1 = scmp.lt.s32.totalorder %s477_s10, %s472_s7 }
  0x13   : > { %p475_p12 = pnand %p474_p11, %p473_p10 }
  0x14   : > { %p480_p2 = por %p479_p1, %p478_p0 }
  0x15   : > { %p476_p13 = pneg %p475_p12 }
  0x17   : > { %p481_p3 = pnand %p480_p2, %p476_p13 }
  0x19   : > { %484 = shalt.err (!%p481_p3)
}
  0x1a   : > { %s536_s18 = smov 128   ;;  %s537_s19 = smov 8  }
  0x1b   : > { %434 = dma.hbm_to_vmem [thread:$0]  (!%p600_p8), %s145_s4, 1536, %s147_s30, %s135_s5, %s536_s18, %s536_s18, %s537_s19  }
  0x1c   : > { %p154_p4 = scmp.lt.s32.totalorder %s534_s15, 3 }
  0x1e   : > { %p155_p5 = pnand %p403_p9, %p154_p4 }
  0x1f   : > { %s160_s22 = sand.u32 (!%p155_p5), 1, %s526_s13  }
  0x20   : > { %158 = sbr.rel (%p155_p5) target bundleno = 335 (0x14f), region = 32  ;;  %s161_s24 = scalar_lea.sflag (!%p155_p5), [#allocation3], %s160_s22 }
  0x21   : > { %s427_s23 = smul.u32 (!%p155_p5), 96, %s160_s22 }
  0x23   : > { %s164_s26 = scalar_lea.vmem (!%p155_p5), [#allocation2], %s427_s23 }
  0x25   : > { %517 = dma.done.wait (%p594_p7), %s161_s24, 1536  }
  0x26   : > { %519 = vsyncadd (%p594_p7), %s161_s24, 4294965760  ;;  %v202_v0 = vld [vmem:[%s164_s26 + $0x10] sm:$0xff]  ;;  %v203_v1 = vld [vmem:[%s164_s26 + $0x18] sm:$0xff]  ;;  %vm206_vm0 = vcmask 261120   ;;  %p188_p6 = scmp.lt.s32.totalorder %s577_s16, 1  ;;  %vm245_vm1 = vcmask 130048  }
  0x27   : > { %v409_v2 = vld [vmem:[%s164_s26 + $0x30] sm:$0xff]  ;;  %v205_v3 = vpack.c.bf16 %v203_v1, %v202_v0  ;;  %v410_v4 = vld [vmem:[%s164_s26 + $0x38] sm:$0xff]  ;;  %v200_v5 = vld [vmem:[%s164_s26] sm:$0xff] }
  0x28   : > { %v201_v6 = vld [vmem:[%s164_s26 + $0x8] sm:$0xff]  ;;  %v254_v7 = vpack.c.bf16 %v410_v4, %v409_v2  ;;  %v407_v8 = vld [vmem:[%s164_s26 + $0x20] sm:$0xff]  ;;  %v417_v13 = vld [vmem:[%s164_s26 + $0x50] sm:$0xff]  ;;  %s674_s16 = smov (!%p188_p6, %s577_s16), 1 }
  0x29   : > { %v408_v9 = vld [vmem:[%s164_s26 + $0x28] sm:$0xff]  ;;  %v194_v10 = vld [vmem:[%s664_s1] sm:$0xff]  ;;  %216 = vmatpush.bf16.msra.mxu0 %v205_v3  ;;  %v204_v11 = vpack.c.bf16 %v201_v6, %v200_v5  ;;  %v418_v14 = vld [vmem:[%s164_s26 + $0x58] sm:$0xff]  ;;  %s428_s5 = smul.u32 48, %s674_s16 }
  0x2a   : > { %v195_v12 = vld [vmem:[%s664_s1 + $0x8] sm:$0xff]  ;;  %261 = vmatpush.bf16.msra.mxu2 %v254_v7  ;;  %v253_v15 = vpack.c.bf16 %v408_v9, %v407_v8  ;;  %v296_v16 = vpack.c.bf16 %v418_v14, %v417_v13  ;;  %v415_v17 = vld [vmem:[%s164_s26 + $0x40] sm:$0xff] }
  0x2b   : > { %v416_v18 = vld [vmem:[%s164_s26 + $0x48] sm:$0xff]  ;;  %v196_v19 = vpack.c.bf16 %v195_v12, %v194_v10  ;;  %v197_v21 = vld [vmem:[%s665_s2] sm:$0xff]  ;;  %s192_s8 = scalar_lea.vmem %s666_s3, %s428_s5 }
  0x2c   : > { %v295_v20 = vpack.c.bf16 %v416_v18, %v415_v17  ;;  %v198_v22 = vld [vmem:[%s665_s2 + $0x8] sm:$0xff] }
  0x2d   : > { %217 = vmatpush.bf16.msra.mxu0 %v204_v11  ;;  %v199_v23 = vpack.c.bf16 %v198_v22, %v197_v21 }
  0x2e   : > { %262 = vmatpush.bf16.msra.mxu2 %v253_v15 }
  0x2f   : > { %v229_v24 = vsel %vm206_vm0, %v199_v23, 0 }
  0x30   : > { %405 = vmatmul.msk.bf16.vlgmr.msra.gmra.mxu0 %vm206_vm0, %v196_v19  ;;  %238 = vmatpush.bf16.xpose.msra.mxu1 %v229_v24 }
  0x31   : > { %303 = vmatpush.bf16.msrb.mxu0 %v296_v16  ;;  %411 = vmatmul.msk.bf16.vlgmr.msra.gmra.mxu2 %vm206_vm0, %v196_v19 }
  0x32   : > { %280 = vmatpush.bf16.xpose.msra.mxu3 %v229_v24 }
  0x35   : > { %304 = vmatpush.bf16.msrb.mxu0 %v295_v20 }
  0x38   : > { %322 = vmatpush.bf16.xpose.msrb.mxu1 %v229_v24 }
  0x40   : > { %419 = vmatmul.msk.bf16.vlgmr.msrb.gmra.mxu0 %vm206_vm0, %v196_v19 }
  0xad   : > { %v219_v25 = vpop.f32.mrf.mxu0 }
  0xb4   : > { %v264_v26 = vpop.f32.mrf.mxu2 }
  0xb5   : > { %v221_v27 = vpop.f32.mrf.mxu0 }
  0xb6   : > { %v224_v28 = vpack.c.bf16 %v221_v27, %v219_v25 }
  0xb8   : > { %406 = vmatmul.msk.bf16.vlgmr.msra.gmra.mxu1 %vm206_vm0, %v224_v28 }
  0xbc   : > { %v266_v29 = vpop.f32.mrf.mxu2 }
  0xbd   : > { %v269_v30 = vpack.c.bf16 %v266_v29, %v264_v26  ;;  %v306_v31 = vpop.f32.mrf.mxu0 }
  0xbf   : > { %412 = vmatmul.msk.bf16.vlgmr.msra.gmra.mxu3 %vm206_vm0, %v269_v30 }
  0xc5   : > { %v308_v32 = vpop.f32.mrf.mxu0 }
  0xc6   : > { %v311_v33 = vpack.c.bf16 %v308_v32, %v306_v31 }
  0xc8   : > { %420 = vmatmul.msk.bf16.vlgmr.msrb.gmra.mxu1 %vm206_vm0, %v311_v33 }
 0x135   : > { %v240_v34 = vpop.f32.mrf.mxu1 }
 0x136   : > { %246 = vst.msk [vmem:[%s192_s8] sm:$0xff] %vm245_vm1, %v240_v34 }
 0x13d   : > { %v242_v35 = vpop.f32.mrf.mxu1 }
 0x13e   : > { %247 = vst.msk [vmem:[%s192_s8 + $0x8] sm:$0xff] %vm245_vm1, %v242_v35 }
 0x142   : > { %v282_v36 = vpop.f32.mrf.mxu3 }
 0x143   : > { %413 = vst.msk [vmem:[%s192_s8 + $0x10] sm:$0xff] %vm245_vm1, %v282_v36 }
 0x145   : > { %v324_v37 = vpop.f32.mrf.mxu1 }
 0x146   : > { %421 = vst.msk [vmem:[%s192_s8 + $0x20] sm:$0xff] %vm245_vm1, %v324_v37 }
 0x14a   : > { %v284_v38 = vpop.f32.mrf.mxu3 }
 0x14b   : > { %414 = vst.msk [vmem:[%s192_s8 + $0x18] sm:$0xff] %vm245_vm1, %v284_v38 }
 0x14d   : > { %v326_v39 = vpop.f32.mrf.mxu1 }
 0x14e   : > { %422 = vst.msk [vmem:[%s192_s8 + $0x28] sm:$0xff] %vm245_vm1, %v326_v39 }
 0x14f PF: > { %p13_p7 = scmp.ge.s32.totalorder %s580_s17, 4   ;;  %s669_s12 = smov %s526_s13 }
 0x150   : > { %s670_s13 = smov %s530_s14  ;;  %s671_s14 = smov %s590_s20 }
 0x151   : > { %s672_s15 = smov %s580_s17  ;;  %15 = sbr.rel (!%p13_p7) target bundleno = 3 (0x3), region = 76 }
 0x156   :  { %353 = vsyncpa [#allocation3], 1 }
 0x157   :  { %355 = vsyncpa [#allocation3 + $0x1], 1 }

// kernel: frozen_clip_image_embedder.6
= control target key start
LH: loop header
LB: loop body
LE: loop exit
PB: predicated region body
PF: predicated region fallthrough
CT: control target
= control target key end

     0   :  { %s455_s18 = smov 0   ;;  %s560_s0 = inlined_call_operand.vmem [shape: f32[2,5,192], index: 0, kind: input, shape index: {}]   ;;  %s561_s1 = inlined_call_operand.vmem [shape: f32[192,32], index: 1, kind: input, shape index: {}]   ;;  %s562_s2 = inlined_call_operand.vmem [shape: f32[5,32], index: 2, kind: input, shape index: {}]   ;;  %s563_s3 = inlined_call_operand.vmem [shape: f32[1,32], index: 3, kind: input, shape index: {}]   ;;  %s564_s4 = inlined_call_operand.vmem [shape: f32[1,32], index: 4, kind: input, shape index: {}]   ;;  %s565_s5 = inlined_call_operand.vmem [shape: f32[2,5,32], index: 5, kind: output, shape index: {}]  }
   0x1 LB: > { %s389_s19 = sadd.s32 4294967295, %s422_s18   ;;  %p393_p0 = scmp.ge.s32.totalorder %s422_s18, 1  ;;  %s422_s18 = sphi %s455_s18, %s15_s18  }
   0x2   : > { %p187_p1 = scmp.lt.s32.totalorder %s422_s18, 3 }
   0x4   : > { %p188_p2 = pnand %p393_p0, %p187_p1 }
   0x5   : > { %p214_p3 = scmp.lt.s32.totalorder (!%p188_p2), %s389_s19, 1 }
   0x6   : > { %191 = sbr.rel (%p188_p2) target bundleno = 444 (0x1bc), region = 40 }
   0xb   : > { %v242_v0 = vld [vmem:[%s561_s1 + $0x70] sm:$0xff]  ;;  %v243_v1 = vld [vmem:[%s561_s1 + $0x78] sm:$0xff]  ;;  %v240_v2 = vld [vmem:[%s561_s1 + $0x60] sm:$0xff]  ;;  %s567_s19 = smov (!%p214_p3, %s389_s19), 1  ;;  %vm265_vm0 = vcmask 523264   ;;  %vm297_vm1 = vcmask 258048  }
   0xc   : > { %v259_v3 = vpack.c.bf16 %v243_v1, %v242_v0  ;;  %v241_v4 = vld [vmem:[%s561_s1 + $0x68] sm:$0xff]  ;;  %v250_v5 = vld [vmem:[%s561_s1 + $0xb0] sm:$0xff]  ;;  %v251_v6 = vld [vmem:[%s561_s1 + $0xb8] sm:$0xff]  ;;  %s400_s21 = sshll.u32 %s567_s19, 4  ;;  %v424_v48 = vmov 32.0   ;;  %s396_s30 = sshll.u32 %s567_s19, 3 }
   0xd   : > { %v258_v7 = vpack.c.bf16 %v241_v4, %v240_v2  ;;  %v263_v8 = vpack.c.bf16 %v251_v6, %v250_v5  ;;  %v248_v9 = vld [vmem:[%s561_s1 + $0xa0] sm:$0xff]  ;;  %v249_v10 = vld [vmem:[%s561_s1 + $0xa8] sm:$0xff]  ;;  %v238_v11 = vld [vmem:[%s561_s1 + $0x50] sm:$0xff]  ;;  %s218_s7 = scalar_lea.vmem %s560_s0, %s400_s21  ;;  %412 = vrcp.f32 %v424_v48  ;;  %s222_s10 = scalar_lea.vmem %s565_s5, %s396_s30 }
   0xe   : > { %269 = vmatpush.bf16.msra.mxu0 %v259_v3  ;;  %v239_v12 = vld [vmem:[%s561_s1 + $0x58] sm:$0xff]  ;;  %v262_v13 = vpack.c.bf16 %v249_v10, %v248_v9  ;;  %v246_v14 = vld [vmem:[%s561_s1 + $0x90] sm:$0xff]  ;;  %v236_v17 = vld [vmem:[%s561_s1 + $0x40] sm:$0xff] }
   0xf   : > { %286 = vmatpush.bf16.msra.mxu1 %v263_v8  ;;  %v247_v15 = vld [vmem:[%s561_s1 + $0x98] sm:$0xff]  ;;  %v257_v16 = vpack.c.bf16 %v239_v12, %v238_v11  ;;  %v237_v18 = vld [vmem:[%s561_s1 + $0x48] sm:$0xff]  ;;  %v244_v20 = vld [vmem:[%s561_s1 + $0x80] sm:$0xff] }
  0x10   : > { %v261_v19 = vpack.c.bf16 %v247_v15, %v246_v14  ;;  %v245_v21 = vld [vmem:[%s561_s1 + $0x88] sm:$0xff]  ;;  %v256_v22 = vpack.c.bf16 %v237_v18, %v236_v17  ;;  %v234_v23 = vld [vmem:[%s561_s1 + $0x30] sm:$0xff]  ;;  %v235_v24 = vld [vmem:[%s561_s1 + $0x38] sm:$0xff] }
  0x11   : > { %v260_v25 = vpack.c.bf16 %v245_v21, %v244_v20  ;;  %v225_v26 = vld [vmem:[%s218_s7 + $0x8] sm:$0x1f]  ;;  %v255_v27 = vpack.c.bf16 %v235_v24, %v234_v23  ;;  %v232_v28 = vld [vmem:[%s561_s1 + $0x20] sm:$0xff]  ;;  %v230_v32 = vld [vmem:[%s561_s1 + $0x10] sm:$0xff] }
  0x12   : > { %270 = vmatpush.bf16.msra.mxu0 %v258_v7  ;;  %v233_v29 = vld [vmem:[%s561_s1 + $0x28] sm:$0xff]  ;;  %v227_v30 = vpack.c.bf16 %v225_v26, %v225_v26  ;;  %v231_v33 = vld [vmem:[%s561_s1 + $0x18] sm:$0xff]  ;;  %v228_v35 = vld [vmem:[%s561_s1] sm:$0xff] }
  0x13   : > { %287 = vmatpush.bf16.msra.mxu1 %v262_v13  ;;  %v254_v31 = vpack.c.bf16 %v233_v29, %v232_v28  ;;  %v253_v34 = vpack.c.bf16 %v231_v33, %v230_v32  ;;  %v229_v36 = vld [vmem:[%s561_s1 + $0x8] sm:$0xff]  ;;  %v224_v38 = vld [vmem:[%s218_s7] sm:$0x1f]  ;;  %v413_v49 = vpop.eup %412 }
  0x14   : > { %v252_v37 = vpack.c.bf16 %v229_v36, %v228_v35  ;;  %v226_v39 = vpack.c.bf16 %v224_v38, %v224_v38  ;;  %v264_v42 = vld [vmem:[%s562_s2] sm:$0x1f]  ;;  %v302_v50 = vmul.f32 32.0, %v413_v49  ;;  %vm306_vm2 = vweird.f32 %v413_v49 }
  0x15   : > { %v410_v5 = vld [vmem:[%s563_s3] ss:$0 sm:$0xff] }
  0x16   : > { %271 = vmatpush.bf16.msra.mxu0 %v257_v16  ;;  %v303_v51 = vsub.f32 1.0, %v302_v50  ;;  %v411_v7 = vld [vmem:[%s564_s4] ss:$0 sm:$0xff] }
  0x17   : > { %288 = vmatpush.bf16.msra.mxu1 %v261_v19 }
  0x18   : > { %v304_v52 = vmul.f32 %v413_v49, %v303_v51 }
  0x1a   : > { %272 = vmatpush.bf16.msra.mxu0 %v256_v22  ;;  %v305_v53 = vadd.f32 %v413_v49, %v304_v52 }
  0x1b   : > { %289 = vmatpush.bf16.msra.mxu1 %v260_v25 }
  0x1c   : > { %v307_v54 = vsel %vm306_vm2, %v413_v49, %v305_v53 }
  0x1e   : > { %273 = vmatpush.bf16.msra.mxu0 %v255_v27  ;;  %397 = vmatmul.msk.bf16.vlgmr.msra.gmra.mxu1 %vm265_vm0, %v227_v30 }
  0x22   : > { %274 = vmatpush.bf16.msra.mxu0 %v254_v31 }
  0x26   : > { %275 = vmatpush.bf16.msra.mxu0 %v253_v34 }
  0x2a   : > { %276 = vmatpush.bf16.msra.mxu0 %v252_v37 }
  0x2d   : > { %277 = vmatmul.bf16.vlgmr.msra.gmra.mxu0 %v226_v39 }
  0x9b   : > { %v291_v40 = vpop.f32.mrf.mxu1 }
  0xa3   : > { %v293_v41 = vpop.f32.mrf.mxu1 }
  0xaa   : > { %v278_v43 = vpop.f32.mrf.mxu0 }
  0xab   : > { %v279_v44 = vadd.f32 %v278_v43, %v264_v42 }
  0xad   : > { %v292_v45 = vadd.f32 %v291_v40, %v279_v44 }
  0xaf   : > { %v298_v46 = vsel %vm297_vm1, %v292_v45, 0.0 }
  0xb0   : > { %299 = vadd.xlane.f32.xlu0 %v298_v46 }
  0xb2   : > { %v280_v47 = vpop.f32.mrf.mxu0 }
 0x123   : > { %v300_v55 = vpop.xlane.xlu0 %299 }
 0x124   : > { %v308_v56 = vmul.f32 %v307_v54, %v300_v55 }
 0x126   : > { %v309_v57 = vsub.f32 %v292_v45, %v308_v56 }
 0x128   : > { %v310_v58 = vmul.f32 %v309_v57, %v309_v57 }
 0x12a   : > { %v311_v59 = vsel %vm297_vm1, %v310_v58, 0.0 }
 0x12b   : > { %312 = vadd.xlane.f32.xlu0 %v311_v59 }
 0x19e   : > { %v313_v60 = vpop.xlane.xlu0 %312 }
 0x19f   : > { %v314_v61 = vmul.f32 %v313_v60, %v307_v54 }
 0x1a1   : > { %v315_v62 = vadd.f32 1e-05, %v314_v61 }
 0x1a3   : > { %414 = vrsqrt.f32 %v315_v62  ;;  %vm322_vm4 = vweird.f32 %v315_v62 }
 0x1a9   : > { %v415_v63 = vpop.eup %414 }
 0x1aa   : > { %v317_v0 = vmul.f32 %v415_v63, %v315_v62  ;;  %vm323_vm3 = vweird.f32 %v415_v63 }
 0x1ab   : > { %vm324_vm5 = vmor %vm322_vm4, %vm323_vm3 }
 0x1ac   : > { %v318_v1 = vmul.f32 %v415_v63, %v317_v0 }
 0x1ae   : > { %v319_v2 = vmul.f32 0.5, %v318_v1 }
 0x1b0   : > { %v320_v3 = vsub.f32 1.5, %v319_v2 }
 0x1b2   : > { %v321_v4 = vmul.f32 %v415_v63, %v320_v3 }
 0x1b4   : > { %v325_v6 = vsel %vm324_vm5, %v415_v63, %v321_v4 }
 0x1b5   : > { %v326_v8 = vmul.f32 %v325_v6, %v309_v57 }
 0x1b7   : > { %v330_v9 = vmul.f32 %v410_v5, %v326_v8 }
 0x1b9   : > { %v334_v10 = vadd.f32 %v411_v7, %v330_v9 }
 0x1bb   : > { %335 = vst.msk [vmem:[%s222_s10] sm:$0x1f] %vm297_vm1, %v334_v10 }
 0x1bc PF: > { %s15_s18 = sadd.s32 1, %s422_s18  }
 0x1bd   : > { %p12_p4 = scmp.ge.s32.totalorder %s15_s18, 4  }
 0x1bf   :  { %14 = sbr.rel (!%p12_p4) target bundleno = 1 (0x1), region = 70 }

// kernel: frozen_clip_image_embedder.9
= control target key start
LH: loop header
LB: loop body
LE: loop exit
PB: predicated region body
PF: predicated region fallthrough
CT: control target
= control target key end

     0   :  { %vm22_vm0 = vcmask 254976   ;;  %s190_s0 = inlined_call_operand.vmem [shape: f32[2,32], index: 0, kind: input, shape index: {}]   ;;  %s191_s1 = inlined_call_operand.vmem [shape: f32[1,32], index: 1, kind: input, shape index: {}]   ;;  %s192_s2 = inlined_call_operand.vmem [shape: f32[1,32], index: 2, kind: input, shape index: {}]   ;;  %s193_s3 = inlined_call_operand.vmem [shape: f32[32,16], index: 3, kind: input, shape index: {}]   ;;  %s194_s4 = inlined_call_operand.hbm [shape: f32[2,16], index: 4, kind: output, shape index: {}]  }
   0x1   :  { %v19_v0 = vld [vmem:[%s190_s0] sm:$0x3] }
   0x2   :  { %v23_v1 = vsel %vm22_vm0, %v19_v0, 0.0 }
   0x3   :  { %9 = vsyncpa [#allocation3], 0  ;;  %24 = vadd.xlane.f32.xlu0 %v23_v1  ;;  %v137_v2 = vmov 32.0   ;;  %v63_v14 = vld [vmem:[%s193_s3 + $0x10] sm:$0xff]  ;;  %v64_v15 = vld [vmem:[%s193_s3 + $0x18] sm:$0xff]  ;;  %vm67_vm5 = vcmask 261120  }
   0x4   :  { %107 = vrcp.f32 %v137_v2  ;;  %v66_v16 = vpack.c.bf16 %v64_v15, %v63_v14  ;;  %v61_v17 = vld [vmem:[%s193_s3] sm:$0xff]  ;;  %v62_v18 = vld [vmem:[%s193_s3 + $0x8] sm:$0xff]  ;;  %s138_s27 = smov [#allocation2]   ;;  %s93_s5 = sshll.u32 %s194_s4, 4  ;;  %vm84_vm6 = vcmask 123904   ;;  %s94_s5 = int_to_ptr.hbm [resolvable:$true] %s93_s5 }
   0x5   :  { %v65_v19 = vpack.c.bf16 %v62_v18, %v61_v17  ;;  %v105_v29 = vld [vmem:[%s191_s1] ss:$0 sm:$0xff]  ;;  %s91_s28 = sshll.u32 %s138_s27, 4  ;;  %s92_s28 = int_to_ptr.vmem [resolvable:$true] %s91_s28 }
   0x6   :  { %77 = vmatpush.bf16.msra.mxu0 %v66_v16  ;;  %v106_v32 = vld [vmem:[%s192_s2] ss:$0 sm:$0xff] }
   0xa   :  { %v108_v3 = vpop.eup %107  ;;  %78 = vmatpush.bf16.msra.mxu0 %v65_v19 }
   0xb   :  { %v27_v4 = vmul.f32 32.0, %v108_v3  ;;  %vm31_vm1 = vweird.f32 %v108_v3 }
   0xd   :  { %v28_v5 = vsub.f32 1.0, %v27_v4 }
   0xf   :  { %v29_v6 = vmul.f32 %v108_v3, %v28_v5 }
  0x11   :  { %v30_v7 = vadd.f32 %v108_v3, %v29_v6 }
  0x13   :  { %v32_v8 = vsel %vm31_vm1, %v108_v3, %v30_v7 }
  0x76   :  { %v25_v9 = vpop.xlane.xlu0 %24 }
  0x77   :  { %v33_v10 = vmul.f32 %v32_v8, %v25_v9 }
  0x79   :  { %v34_v11 = vsub.f32 %v19_v0, %v33_v10 }
  0x7b   :  { %v35_v12 = vmul.f32 %v34_v11, %v34_v11 }
  0x7d   :  { %v36_v13 = vsel %vm22_vm0, %v35_v12, 0.0 }
  0x7e   :  { %37 = vadd.xlane.f32.xlu0 %v36_v13 }
  0xf1   :  { %v38_v20 = vpop.xlane.xlu0 %37 }
  0xf2   :  { %v39_v21 = vmul.f32 %v38_v20, %v32_v8 }
  0xf4   :  { %v40_v22 = vadd.f32 1e-05, %v39_v21 }
  0xf6   :  { %109 = vrsqrt.f32 %v40_v22  ;;  %vm47_vm3 = vweird.f32 %v40_v22 }
  0xfc   :  { %v110_v23 = vpop.eup %109 }
  0xfd   :  { %v42_v24 = vmul.f32 %v110_v23, %v40_v22  ;;  %vm48_vm2 = vweird.f32 %v110_v23 }
  0xfe   :  { %vm49_vm4 = vmor %vm47_vm3, %vm48_vm2 }
  0xff   :  { %v43_v25 = vmul.f32 %v110_v23, %v42_v24 }
 0x101   :  { %v44_v26 = vmul.f32 0.5, %v43_v25 }
 0x103   :  { %v45_v27 = vsub.f32 1.5, %v44_v26 }
 0x105   :  { %v46_v28 = vmul.f32 %v110_v23, %v45_v27 }
 0x107   :  { %v50_v30 = vsel %vm49_vm4, %v110_v23, %v46_v28 }
 0x108   :  { %v51_v31 = vmul.f32 %v50_v30, %v34_v11 }
 0x10a   :  { %v55_v33 = vmul.f32 %v105_v29, %v51_v31 }
 0x10c   :  { %v59_v34 = vadd.f32 %v106_v32, %v55_v33 }
 0x10e   :  { %v60_v35 = vpack.c.bf16 %v59_v34, %v59_v34 }
 0x110   :  { %102 = vmatmul.msk.bf16.vlgmr.msra.gmra.mxu0 %vm67_vm5, %v60_v35 }
 0x18d   :  { %v80_v36 = vpop.f32.mrf.mxu0 }
 0x18e   :  { %85 = vst.msk [vmem:[#allocation2] sm:$0x3] %vm84_vm6, %v80_v36 }
 0x18f   :  { %96 = dma.vmem_to_hbm [thread:$0]  %s92_s28, 32, %s94_s5, [#allocation3]  }
 0x195   :  { %v82_v37 = vpop.f32.mrf.mxu0 }
 0x196   :  { %135 = dma.done.wait [#allocation3], 32  }
 0x197   :  { %136 = vsyncadd [#allocation3], 4294967264 }
 0x198   :  { %101 = vsyncpa [#allocation3], 1 }

// kernel: frozen_clip_image_embedder.7
= control target key start
LH: loop header
LB: loop body
LE: loop exit
PB: predicated region body
PF: predicated region fallthrough
CT: control target
= control target key end

     0   :  { %s1255_s24 = smov 0   ;;  %s1505_s0 = inlined_call_operand.vmem [shape: f32[2,5,32], index: 0, kind: input, shape index: {}]   ;;  %s1506_s1 = inlined_call_operand.vmem [shape: f32[1,32], index: 1, kind: input, shape index: {}]   ;;  %s1507_s2 = inlined_call_operand.vmem [shape: f32[1,32], index: 2, kind: input, shape index: {}]   ;;  %s1508_s3 = inlined_call_operand.vmem [shape: f32[2,32,16], index: 3, kind: input, shape index: {}]   ;;  %s1509_s4 = inlined_call_operand.vmem [shape: f32[2,1,16], index: 4, kind: input, shape index: {}]   ;;  %s1510_s5 = inlined_call_operand.vmem [shape: f32[2,32,16], index: 5, kind: input, shape index: {}]   ;;  %s1511_s6 = inlined_call_operand.vmem [shape: f32[2,1,16], index: 6, kind: input, shape index: {}]   ;;  %s1512_s7 = inlined_call_operand.vmem [shape: f32[2,32,16], index: 7, kind: input, shape index: {}]   ;;  %s1513_s8 = inlined_call_operand.vmem [shape: f32[2,1,16], index: 8, kind: input, shape index: {}]   ;;  %s1514_s9 = inlined_call_operand.vmem [shape: f32[2,16,32], index: 9, kind: input, shape index: {}]   ;;  %s1515_s10 = inlined_call_operand.vmem [shape: f32[1,32], index: 10, kind: input, shape index: {}]   ;;  %s1516_s11 = inlined_call_operand.vmem [shape: f32[1,32], index: 11, kind: input, shape index: {}]   ;;  %s1517_s12 = inlined_call_operand.vmem [shape: f32[1,32], index: 12, kind: input, shape index: {}]   ;;  %s1518_s13 = inlined_call_operand.vmem [shape: f32[32,128], index: 13, kind: input, shape index: {}]   ;;  %s1519_s14 = inlined_call_operand.vmem [shape: f32[1,128], index: 14, kind: input, shape index: {}]   ;;  %s1520_s15 = inlined_call_operand.vmem [shape: f32[128,32], index: 15, kind: input, shape index: {}]   ;;  %s1521_s16 = inlined_call_operand.vmem [shape: f32[1,32], index: 16, kind: input, shape index: {}]   ;;  %s1522_s17 = inlined_call_operand.vmem [shape: f32[2,5,32], index: 17, kind: output, shape index: {}]  }
   0x1   :  { %1523 = sst [smem:[#allocation2_spill]] %s1505_s0 }
   0x2   :  { %1524 = sst [smem:[#allocation3_spill]] %s1506_s1 }
   0x3 LB: > { %s1074_s25 = sadd.s32 4294967295, %s1161_s24   ;;  %p1078_p0 = scmp.ge.s32.totalorder %s1161_s24, 1  ;;  %s1161_s24 = sphi %s1255_s24, %s27_s24  }
   0x4   : > { %p486_p1 = scmp.lt.s32.totalorder %s1161_s24, 3 }
   0x6   : > { %p487_p2 = pnand %p1078_p0, %p486_p1 }
   0x7   : > { %p536_p3 = scmp.lt.s32.totalorder (!%p487_p2), %s1074_s25, 1  ;;  %s1525_s29 = sld [smem:[#allocation2_spill]] (!%p487_p2) }
   0x8   : > { %490 = sbr.rel (%p487_p2) target bundleno = 2053 (0x805), region = 88 }
   0xd   : > { %s1528_s25 = smov (!%p536_p3, %s1074_s25), 1  ;;  %vm548_vm0 = vcmask 258048   ;;  %v1163_v2 = vmov 32.0   ;;  %v589_v14 = vld [vmem:[%s1508_s3 + $0x10] sm:$0xff]  ;;  %v590_v15 = vld [vmem:[%s1508_s3 + $0x18] sm:$0xff]  ;;  %v587_v23 = vld [vmem:[%s1508_s3] sm:$0xff] }
   0xe   : > { %s1079_s26 = sshll.u32 %s1528_s25, 3  ;;  %1137 = vrcp.f32 %v1163_v2  ;;  %v616_v16 = vld [vmem:[%s1510_s5 + $0x10] sm:$0xff]  ;;  %v592_v17 = vpack.c.bf16 %v590_v15, %v589_v14  ;;  %v617_v18 = vld [vmem:[%s1510_s5 + $0x18] sm:$0xff]  ;;  %v588_v24 = vld [vmem:[%s1508_s3 + $0x8] sm:$0xff]  ;;  %vm597_vm5 = vcmask 261120   ;;  %vm662_vm6 = vcmask 130048  }
   0xf   : > { %s539_s0 = scalar_lea.vmem %s1525_s29, %s1079_s26  ;;  %v1088_v19 = vld [vmem:[%s1508_s3 + $0x30] sm:$0xff]  ;;  %v1089_v20 = vld [vmem:[%s1508_s3 + $0x38] sm:$0xff]  ;;  %v619_v21 = vpack.c.bf16 %v617_v18, %v616_v16  ;;  %v614_v25 = vld [vmem:[%s1510_s5] sm:$0xff]  ;;  %v591_v26 = vpack.c.bf16 %v588_v24, %v587_v23  ;;  %s1526_s29 = sld [smem:[#allocation3_spill]]  ;;  %vm701_vm7 = vcmask 1041408   ;;  %vm702_vm8 = vcmask 1042432  }
  0x10   : > { %v1271_v0 = vld [vmem:[%s539_s0] sm:$0x1f]  ;;  %v731_v22 = vpack.c.bf16 %v1089_v20, %v1088_v19  ;;  %607 = vmatpush.bf16.msra.mxu0 %v592_v17  ;;  %v615_v27 = vld [vmem:[%s1510_s5 + $0x8] sm:$0xff]  ;;  %v639_v33 = vld [vmem:[%s1512_s7 + $0x10] sm:$0xff]  ;;  %v1164_v18 = vmov 65535   ;;  %vm683_vm9 = vcmask 36864   ;;  %s543_s21 = scalar_lea.vmem %s1522_s17, %s1079_s26 }
  0x11   : > { %v549_v1 = vsel %vm548_vm0, %v1271_v0, 0.0  ;;  %630 = vmatpush.bf16.msra.mxu2 %v619_v21  ;;  %v1086_v28 = vld [vmem:[%s1508_s3 + $0x20] sm:$0xff]  ;;  %v1087_v29 = vld [vmem:[%s1508_s3 + $0x28] sm:$0xff]  ;;  %v618_v30 = vpack.c.bf16 %v615_v27, %v614_v25  ;;  %v640_v34 = vld [vmem:[%s1512_s7 + $0x18] sm:$0xff]  ;;  %v703_v19 = vsel %vm701_vm7, 4294967295, %v1164_v18  ;;  %vm697_vm10 = vcmask 39936  }
  0x12   : > { %550 = vadd.xlane.f32.xlu0 %v549_v1  ;;  %743 = vmatpush.bf16.msra.mxu1 %v731_v22  ;;  %v730_v31 = vpack.c.bf16 %v1087_v29, %v1086_v28  ;;  %v637_v35 = vld [vmem:[%s1512_s7] sm:$0xff]  ;;  %v642_v37 = vpack.c.bf16 %v640_v34, %v639_v33  ;;  %v638_v38 = vld [vmem:[%s1512_s7 + $0x8] sm:$0xff]  ;;  %v1094_v52 = vld [vmem:[%s1510_s5 + $0x30] sm:$0xff]  ;;  %v704_v22 = vsel %vm702_vm8, %v703_v19, 0 }
  0x13   : > { %v641_v40 = vpack.c.bf16 %v638_v38, %v637_v35  ;;  %v1125_v49 = vld [vmem:[%s1507_s2] ss:$0 sm:$0xff]  ;;  %v1095_v53 = vld [vmem:[%s1510_s5 + $0x38] sm:$0xff]  ;;  %v1093_v58 = vld [vmem:[%s1510_s5 + $0x28] sm:$0xff] }
  0x14   : > { %v1138_v3 = vpop.eup %1137  ;;  %608 = vmatpush.bf16.msra.mxu0 %v591_v26  ;;  %v756_v55 = vpack.c.bf16 %v1095_v53, %v1094_v52  ;;  %v1092_v57 = vld [vmem:[%s1510_s5 + $0x20] sm:$0xff]  ;;  %v1100_v1 = vld [vmem:[%s1512_s7 + $0x30] sm:$0xff]  ;;  %v1101_v2 = vld [vmem:[%s1512_s7 + $0x38] sm:$0xff] }
  0x15   : > { %v553_v4 = vmul.f32 32.0, %v1138_v3  ;;  %vm557_vm1 = vweird.f32 %v1138_v3  ;;  %631 = vmatpush.bf16.msra.mxu2 %v618_v30  ;;  %v1124_v47 = vld [vmem:[%s1526_s29] ss:$0 sm:$0xff]  ;;  %v755_v59 = vpack.c.bf16 %v1093_v58, %v1092_v57  ;;  %v1130_v26 = vld [vmem:[%s1511_s6 + $0x1] ss:$0 sm:$0xff] }
  0x16   : > { %744 = vmatpush.bf16.msra.mxu1 %v730_v31  ;;  %v1128_v62 = vld [vmem:[%s1511_s6] ss:$0 sm:$0xff] }
  0x17   : > { %v554_v5 = vsub.f32 1.0, %v553_v4  ;;  %v1129_v17 = vld [vmem:[%s1513_s8] ss:$0 sm:$0xff] }
  0x19   : > { %v555_v6 = vmul.f32 %v1138_v3, %v554_v5  ;;  %653 = vmatpush.bf16.msrb.mxu2 %v642_v37  ;;  %v1126_v5 = vld [vmem:[%s1509_s4] ss:$0 sm:$0xff] }
  0x1b   : > { %v556_v7 = vadd.f32 %v1138_v3, %v555_v6 }
  0x1d   : > { %v1275_v8 = vsel %vm557_vm1, %v1138_v3, %v556_v7  ;;  %654 = vmatpush.bf16.msrb.mxu2 %v641_v40 }
  0x85   : > { %v551_v9 = vpop.xlane.xlu0 %550 }
  0x86   : > { %v559_v10 = vmul.f32 %v1275_v8, %v551_v9  ;;  %v781_v9 = vpack.c.bf16 %v1101_v2, %v1100_v1 }
  0x88   : > { %v560_v11 = vsub.f32 %v1271_v0, %v559_v10  ;;  %v1098_v10 = vld [vmem:[%s1512_s7 + $0x20] sm:$0xff] }
  0x8a   : > { %v561_v12 = vmul.f32 %v560_v11, %v560_v11 }
  0x8c   : > { %v562_v13 = vsel %vm548_vm0, %v561_v12, 0.0 }
  0x8d   : > { %563 = vadd.xlane.f32.xlu0 %v562_v13 }
 0x100   : > { %v564_v32 = vpop.xlane.xlu0 %563 }
 0x101   : > { %v565_v36 = vmul.f32 %v564_v32, %v1275_v8 }
 0x103   : > { %v566_v39 = vadd.f32 1e-05, %v565_v36  ;;  %v1131_v36 = vld [vmem:[%s1513_s8 + $0x1] ss:$0 sm:$0xff] }
 0x105   : > { %1139 = vrsqrt.f32 %v566_v39  ;;  %vm573_vm3 = vweird.f32 %v566_v39 }
 0x10b   : > { %v1140_v41 = vpop.eup %1139 }
 0x10c   : > { %v568_v42 = vmul.f32 %v1140_v41, %v566_v39  ;;  %vm574_vm2 = vweird.f32 %v1140_v41 }
 0x10d   : > { %vm575_vm4 = vmor %vm573_vm3, %vm574_vm2 }
 0x10e   : > { %v569_v43 = vmul.f32 %v1140_v41, %v568_v42 }
 0x110   : > { %v570_v44 = vmul.f32 0.5, %v569_v43 }
 0x112   : > { %v571_v45 = vsub.f32 1.5, %v570_v44 }
 0x114   : > { %v572_v46 = vmul.f32 %v1140_v41, %v571_v45 }
 0x116   : > { %v576_v48 = vsel %vm575_vm4, %v1140_v41, %v572_v46 }
 0x117   : > { %v577_v50 = vmul.f32 %v576_v48, %v560_v11  ;;  %v1099_v11 = vld [vmem:[%s1512_s7 + $0x28] sm:$0xff] }
 0x118   : > { %v780_v14 = vpack.c.bf16 %v1099_v11, %v1098_v10  ;;  %v1107_v10 = vld [vmem:[%s1514_s9 + $0x18] sm:$0xff] }
 0x119   : > { %v581_v51 = vmul.f32 %v1124_v47, %v577_v50 }
 0x11b   : > { %v585_v54 = vadd.f32 %v1125_v49, %v581_v51  ;;  %v1127_v51 = vld [vmem:[%s1509_s4 + $0x1] ss:$0 sm:$0xff] }
 0x11d   : > { %v586_v56 = vpack.c.bf16 %v585_v54, %v585_v54  ;;  %v722_v54 = vld [vmem:[%s1514_s9] sm:$0xff] }
 0x11f   : > { %1081 = vmatmul.msk.bf16.vlgmr.msra.gmra.mxu0 %vm597_vm5, %v586_v56  ;;  %1082 = vmatmul.msk.bf16.vlgmr.msra.gmra.mxu2 %vm597_vm5, %v586_v56 }
 0x120   : > { %1091 = vmatmul.msk.bf16.vlgmr.msra.gmra.mxu1 %vm597_vm5, %v586_v56  ;;  %768 = vmatpush.bf16.msra.mxu2 %v756_v55  ;;  %v723_v55 = vld [vmem:[%s1514_s9 + $0x8] sm:$0xff] }
 0x124   : > { %769 = vmatpush.bf16.msra.mxu2 %v755_v59 }
 0x12f   : > { %1083 = vmatmul.msk.bf16.vlgmr.msrb.gmra.mxu2 %vm597_vm5, %v586_v56 }
 0x13f   : > { %1097 = vmatmul.msk.bf16.vlgmr.msra.gmra.mxu2 %vm597_vm5, %v586_v56 }
 0x19c   : > { %v610_v60 = vpop.f32.mrf.mxu0 }
 0x19d   : > { %v1352_v61 = vpop.f32.mrf.mxu1  ;;  %v611_v13 = vadd.f32 %v1126_v5, %v610_v60 }
 0x19e   : > { %v747_v52 = vadd.f32 %v1127_v51, %v1352_v61  ;;  %v992_v51 = vld [vmem:[%s1520_s15 + $0x70] sm:$0xff] }
 0x19f   : > { %v660_v16 = vpack.c.bf16 %v611_v13, %v611_v13 }
 0x1a0   : > { %v800_v53 = vpack.c.bf16 %v747_v52, %v747_v52  ;;  %v993_v52 = vld [vmem:[%s1520_s15 + $0x78] sm:$0xff] }
 0x1a2   : > { %v633_v63 = vpop.f32.mrf.mxu2 }
 0x1a3   : > { %v634_v3 = vadd.f32 %v1128_v62, %v633_v63 }
 0x1a4   : > { %v612_v4 = vpop.f32.mrf.mxu0 }
 0x1a5   : > { %v661_v6 = vpack.c.bf16 %v634_v3, %v634_v3  ;;  %v748_v7 = vpop.f32.mrf.mxu1 }
 0x1a7   : > { %v667_v12 = vsel %vm662_vm6, %v661_v6, 0 }
 0x1a8   : > { %676 = vmatpush.bf16.xpose.msra.mxu3 %v667_v12 }
 0x1aa   : > { %v635_v15 = vpop.f32.mrf.mxu2 }
 0x1af   : > { %1084 = vmatmul.msk.bf16.vlgmr.msra.gmra.mxu3 %vm662_vm6, %v660_v16 }
 0x1b0   : > { %793 = vmatpush.bf16.msrb.mxu3 %v781_v9  ;;  %v1106_v9 = vld [vmem:[%s1514_s9 + $0x10] sm:$0xff] }
 0x1b1   : > { %v858_v11 = vpack.c.bf16 %v1107_v10, %v1106_v9  ;;  %v1135_v9 = vld [vmem:[%s1519_s14] ss:$0 sm:$0xff] }
 0x1b2   : > { %v656_v20 = vpop.f32.mrf.mxu2 }
 0x1b3   : > { %v657_v21 = vadd.f32 %v1129_v17, %v656_v20  ;;  %869 = vmatpush.bf16.msrb.mxu2 %v858_v11 }
 0x1b4   : > { %794 = vmatpush.bf16.msrb.mxu3 %v780_v14 }
 0x1b5   : > { %v696_v23 = vpack.c.bf16 %v657_v21, %v657_v21  ;;  %v1132_v21 = vld [vmem:[%s1515_s10] ss:$0 sm:$0xff] }
 0x1b7   : > { %v706_v24 = vand.u32 %v704_v22, %v696_v23 }
 0x1b9   : > { %715 = vmatpush.bf16.msrb.mxu0 %v706_v24 }
 0x1ba   : > { %v658_v25 = vpop.f32.mrf.mxu2 }
 0x1bf   : > { %1103 = vmatmul.msk.bf16.vlgmr.msrb.gmra.mxu3 %vm597_vm5, %v586_v56  ;;  %v724_v56 = vpack.c.bf16 %v723_v55, %v722_v54  ;;  %v990_v54 = vld [vmem:[%s1520_s15 + $0x60] sm:$0xff]  ;;  %v991_v55 = vld [vmem:[%s1520_s15 + $0x68] sm:$0xff] }
 0x1c1   : > { %885 = vmatpush.bf16.msra.mxu3 %v724_v56  ;;  %v1000_v56 = vpack.c.bf16 %v991_v55, %v990_v54 }
 0x1c2   : > { %v771_v27 = vpop.f32.mrf.mxu2 }
 0x1c3   : > { %v772_v28 = vadd.f32 %v1130_v26, %v771_v27 }
 0x1c5   : > { %v801_v29 = vpack.c.bf16 %v772_v28, %v772_v28 }
 0x1c7   : > { %v806_v30 = vsel %vm662_vm6, %v801_v29, 0 }
 0x1c8   : > { %815 = vmatpush.bf16.xpose.msra.mxu0 %v806_v30 }
 0x1ca   : > { %v773_v31 = vpop.f32.mrf.mxu2 }
 0x1cb   : > { %v933_v31 = vld [vmem:[%s1518_s13 + $0x18] sm:$0xff] }
 0x232   : > { %v678_v32 = vpop.f32.mrf.mxu3 }
 0x233   : > { %v682_v33 = vmul.f32 0.25, %v678_v32 }
 0x235   : > { %v684_v34 = vsel %vm683_vm9, %v682_v33, -inf }
 0x236   : > { %685 = vmax.xlane.f32.xlu1 %v684_v34  ;;  %v931_v34 = vld [vmem:[%s1518_s13 + $0x8] sm:$0xff] }
 0x23a   : > { %v680_v35 = vpop.f32.mrf.mxu3 }
 0x242   : > { %v796_v37 = vpop.f32.mrf.mxu3 }
 0x243   : > { %v797_v38 = vadd.f32 %v1131_v36, %v796_v37 }
 0x245   : > { %v834_v39 = vpack.c.bf16 %v797_v38, %v797_v38 }
 0x247   : > { %v839_v40 = vand.u32 %v834_v39, %v704_v22 }
 0x249   : > { %848 = vmatpush.bf16.msrb.mxu1 %v839_v40 }
 0x24a   : > { %v798_v41 = vpop.f32.mrf.mxu3 }
 0x2a9   : > { %v686_v42 = vpop.xlane.xlu1 %685 }
 0x2aa   : > { %v687_v43 = vsub.f32 %v682_v33, %v686_v42  ;;  %v930_v33 = vld [vmem:[%s1518_s13] sm:$0xff] }
 0x2ab   : > { %v934_v35 = vpack.c.bf16 %v931_v34, %v930_v33  ;;  %v1136_v33 = vld [vmem:[%s1521_s16] ss:$0 sm:$0xff] }
 0x2ac   : > { %v688_v44 = vmul.f32 1.442695, %v687_v43 }
 0x2ae   : > { %1141 = vpow2.f32 %v688_v44 }
 0x2b4   : > { %v1142_v45 = vpop.eup %1141 }
 0x2b5   : > { %v690_v46 = vsel %vm683_vm9, %v1142_v45, 0.0 }
 0x2b6   : > { %691 = vadd.xlane.f32.xlu1 %v690_v46 }
 0x329   : > { %v692_v47 = vpop.xlane.xlu1 %691 }
 0x32a   : > { %1143 = vrcp.f32 %v692_v47 }
 0x330   : > { %v1144_v48 = vpop.eup %1143 }
 0x331   : > { %v694_v49 = vmul.f32 %v1144_v48, %v1142_v45  ;;  %v1133_v45 = vld [vmem:[%s1516_s11] ss:$0 sm:$0xff] }
 0x333   : > { %v695_v50 = vpack.c.bf16 %v694_v49, %v694_v49 }
 0x335   : > { %1085 = vmatmul.msk.bf16.vlgmr.msrb.gmra.mxu0 %vm697_vm10, %v695_v50 }
 0x345   : > { %1104 = vmatmul.msk.bf16.vlgmr.msra.gmra.mxu0 %vm662_vm6, %v800_v53  ;;  %v1001_v53 = vpack.c.bf16 %v993_v52, %v992_v51 }
 0x347   : > { %1006 = vmatpush.bf16.msra.mxu1 %v1001_v53 }
 0x34b   : > { %1007 = vmatpush.bf16.msra.mxu1 %v1000_v56 }
 0x3b2   : > { %v717_v57 = vpop.f32.mrf.mxu0 }
 0x3b3   : > { %v721_v58 = vpack.c.bf16 %v717_v57, %v717_v57  ;;  %v988_v57 = vld [vmem:[%s1520_s15 + $0x50] sm:$0xff] }
 0x3b5   : > { %1109 = vmatmul.msk.bf16.vlgmr.msra.gmra.mxu3 %vm662_vm6, %v721_v58  ;;  %v989_v58 = vld [vmem:[%s1520_s15 + $0x58] sm:$0xff] }
 0x3ba   : > { %v719_v59 = vpop.f32.mrf.mxu0 }
 0x3bb   : > { %v999_v59 = vpack.c.bf16 %v989_v58, %v988_v57 }
 0x3bd   : > { %1008 = vmatpush.bf16.msra.mxu1 %v999_v59 }
 0x3c2   : > { %v817_v60 = vpop.f32.mrf.mxu0 }
 0x3c3   : > { %v821_v61 = vmul.f32 0.25, %v817_v60  ;;  %v986_v60 = vld [vmem:[%s1520_s15 + $0x40] sm:$0xff] }
 0x3c5   : > { %v822_v62 = vsel %vm683_vm9, %v821_v61, -inf }
 0x3c6   : > { %823 = vmax.xlane.f32.xlu2 %v822_v62 }
 0x3ca   : > { %v819_v63 = vpop.f32.mrf.mxu0 }
 0x3cb   : > { %v984_v63 = vld [vmem:[%s1520_s15 + $0x30] sm:$0xff] }
 0x438   : > { %v887_v1 = vpop.f32.mrf.mxu3 }
 0x439   : > { %v824_v2 = vpop.xlane.xlu2 %823 }
 0x43a   : > { %v825_v3 = vsub.f32 %v821_v61, %v824_v2  ;;  %v987_v61 = vld [vmem:[%s1520_s15 + $0x48] sm:$0xff] }
 0x43b   : > { %v998_v62 = vpack.c.bf16 %v987_v61, %v986_v60 }
 0x43c   : > { %v826_v4 = vmul.f32 1.442695, %v825_v3  ;;  %v982_v3 = vld [vmem:[%s1520_s15 + $0x20] sm:$0xff] }
 0x43d   : > { %1009 = vmatpush.bf16.msra.mxu1 %v998_v62 }
 0x43e   : > { %1145 = vpow2.f32 %v826_v4  ;;  %v983_v4 = vld [vmem:[%s1520_s15 + $0x28] sm:$0xff] }
 0x440   : > { %v889_v5 = vpop.f32.mrf.mxu3 }
 0x441   : > { %v996_v5 = vpack.c.bf16 %v983_v4, %v982_v3 }
 0x444   : > { %v1146_v6 = vpop.eup %1145 }
 0x445   : > { %v828_v7 = vsel %vm683_vm9, %v1146_v6, 0.0 }
 0x446   : > { %829 = vadd.xlane.f32.xlu2 %v828_v7  ;;  %v981_v7 = vld [vmem:[%s1520_s15 + $0x18] sm:$0xff] }
 0x4b9   : > { %v830_v12 = vpop.xlane.xlu2 %829 }
 0x4ba   : > { %1147 = vrcp.f32 %v830_v12  ;;  %v978_v12 = vld [vmem:[%s1520_s15] sm:$0xff] }
 0x4c0   : > { %v1148_v13 = vpop.eup %1147 }
 0x4c1   : > { %v832_v14 = vmul.f32 %v1148_v13, %v1146_v6  ;;  %v980_v6 = vld [vmem:[%s1520_s15 + $0x10] sm:$0xff]  ;;  %v979_v13 = vld [vmem:[%s1520_s15 + $0x8] sm:$0xff] }
 0x4c2   : > { %v995_v10 = vpack.c.bf16 %v981_v7, %v980_v6 }
 0x4c3   : > { %v833_v15 = vpack.c.bf16 %v832_v14, %v832_v14 }
 0x4c5   : > { %1105 = vmatmul.msk.bf16.vlgmr.msrb.gmra.mxu1 %vm697_vm10, %v833_v15  ;;  %v994_v15 = vpack.c.bf16 %v979_v13, %v978_v12 }
 0x542   : > { %v850_v16 = vpop.f32.mrf.mxu1 }
 0x543   : > { %v854_v17 = vpack.c.bf16 %v850_v16, %v850_v16 }
 0x545   : > { %1108 = vmatmul.msk.bf16.vlgmr.msrb.gmra.mxu2 %vm662_vm6, %v854_v17 }
 0x54a   : > { %v852_v18 = vpop.f32.mrf.mxu1 }
 0x5c8   : > { %v871_v19 = vpop.f32.mrf.mxu2 }
 0x5c9   : > { %v888_v20 = vadd.f32 %v887_v1, %v871_v19  ;;  %v985_v1 = vld [vmem:[%s1520_s15 + $0x38] sm:$0xff] }
 0x5ca   : > { %v997_v2 = vpack.c.bf16 %v985_v1, %v984_v63 }
 0x5cb   : > { %v891_v22 = vadd.f32 %v888_v20, %v1271_v0  ;;  %v932_v0 = vld [vmem:[%s1518_s13 + $0x10] sm:$0xff] }
 0x5cc   : > { %v935_v32 = vpack.c.bf16 %v933_v31, %v932_v0  ;;  %1010 = vmatpush.bf16.msra.mxu1 %v997_v2 }
 0x5cd   : > { %v1414_v23 = vadd.f32 %v1132_v21, %v891_v22 }
 0x5ce   : > { %949 = vmatpush.bf16.msrb.mxu0 %v935_v32 }
 0x5cf   : > { %v899_v24 = vsel %vm548_vm0, %v1414_v23, 0.0 }
 0x5d0   : > { %900 = vadd.xlane.f32.xlu0 %v899_v24  ;;  %v873_v25 = vpop.f32.mrf.mxu2  ;;  %1011 = vmatpush.bf16.msra.mxu1 %v996_v5 }
 0x5d2   : > { %950 = vmatpush.bf16.msrb.mxu0 %v934_v35 }
 0x5d4   : > { %1012 = vmatpush.bf16.msra.mxu1 %v995_v10 }
 0x5d8   : > { %1013 = vmatpush.bf16.msra.mxu1 %v994_v15 }
 0x643   : > { %v901_v26 = vpop.xlane.xlu0 %900 }
 0x644   : > { %v902_v27 = vmul.f32 %v901_v26, %v1275_v8 }
 0x646   : > { %v903_v28 = vsub.f32 %v1414_v23, %v902_v27 }
 0x648   : > { %v904_v29 = vmul.f32 %v903_v28, %v903_v28 }
 0x64a   : > { %v905_v30 = vsel %vm548_vm0, %v904_v29, 0.0 }
 0x64b   : > { %906 = vadd.xlane.f32.xlu1 %v905_v30 }
 0x6be   : > { %v907_v36 = vpop.xlane.xlu1 %906 }
 0x6bf   : > { %v908_v37 = vmul.f32 %v907_v36, %v1275_v8  ;;  %v1134_v8 = vld [vmem:[%s1517_s12] ss:$0 sm:$0xff] }
 0x6c1   : > { %v909_v38 = vadd.f32 1e-05, %v908_v37 }
 0x6c3   : > { %1149 = vrsqrt.f32 %v909_v38  ;;  %vm916_vm12 = vweird.f32 %v909_v38 }
 0x6c9   : > { %v1150_v39 = vpop.eup %1149 }
 0x6ca   : > { %v911_v40 = vmul.f32 %v1150_v39, %v909_v38  ;;  %vm917_vm11 = vweird.f32 %v1150_v39 }
 0x6cb   : > { %vm918_vm13 = vmor %vm916_vm12, %vm917_vm11 }
 0x6cc   : > { %v912_v41 = vmul.f32 %v1150_v39, %v911_v40 }
 0x6ce   : > { %v913_v42 = vmul.f32 0.5, %v912_v41 }
 0x6d0   : > { %v914_v43 = vsub.f32 1.5, %v913_v42 }
 0x6d2   : > { %v915_v44 = vmul.f32 %v1150_v39, %v914_v43 }
 0x6d4   : > { %v919_v46 = vsel %vm918_vm13, %v1150_v39, %v915_v44 }
 0x6d5   : > { %v920_v47 = vmul.f32 %v919_v46, %v903_v28 }
 0x6d7   : > { %v924_v48 = vmul.f32 %v1133_v45, %v920_v47 }
 0x6d9   : > { %v928_v49 = vadd.f32 %v1134_v8, %v924_v48 }
 0x6db   : > { %v929_v50 = vpack.c.bf16 %v928_v49, %v928_v49 }
 0x6dd   : > { %1110 = vmatmul.msk.bf16.vlgmr.msrb.gmra.mxu0 %vm597_vm5, %v929_v50 }
 0x75a   : > { %v952_v11 = vpop.f32.mrf.mxu0 }
 0x75b   : > { %v953_v14 = vadd.f32 %v1135_v9, %v952_v11 }
 0x75d   : > { %v1111_v16 = vmul.f32 -1.702, %v953_v14 }
 0x75f   : > { %v958_v17 = vmul.f32 1.442695, %v1111_v16 }
 0x761   : > { %1151 = vpow2.f32 %v958_v17 }
 0x762   : > { %v954_v18 = vpop.f32.mrf.mxu0 }
 0x767   : > { %v1152_v19 = vpop.eup %1151 }
 0x768   : > { %v960_v20 = vadd.f32 1.0, %v1152_v19 }
 0x76a   : > { %1153 = vrcp.f32 %v960_v20  ;;  %v972_v25 = vand.u32 2147483648, %v960_v20  ;;  %v970_v27 = vand.u32 2147483647, %v960_v20  ;;  %vm966_vm15 = vweird.f32 %v960_v20 }
 0x76c   : > { %v973_v29 = vor.u32 1.1754944e-38, %v972_v25  ;;  %vm971_vm2 = vcmp.eq.f32.partialorder %v970_v27, 8.507059e+37 }
 0x770   : > { %v1154_v21 = vpop.eup %1153 }
 0x771   : > { %v962_v22 = vmul.f32 %v1154_v21, %v960_v20  ;;  %vm967_vm14 = vweird.f32 %v1154_v21 }
 0x772   : > { %vm968_vm1 = vmor %vm966_vm15, %vm967_vm14 }
 0x773   : > { %v963_v24 = vsub.f32 1.0, %v962_v22 }
 0x775   : > { %v964_v26 = vmul.f32 %v1154_v21, %v963_v24 }
 0x777   : > { %v965_v28 = vadd.f32 %v1154_v21, %v964_v26 }
 0x779   : > { %v969_v30 = vsel %vm968_vm1, %v1154_v21, %v965_v28 }
 0x77a   : > { %v974_v0 = vsel %vm971_vm2, %v973_v29, %v969_v30 }
 0x77b   : > { %v976_v31 = vmul.f32 %v974_v0, %v953_v14 }
 0x77d   : > { %v977_v32 = vpack.c.bf16 %v976_v31, %v976_v31 }
 0x77f   : > { %1014 = vmatmul.bf16.vlgmr.msra.gmra.mxu1 %v977_v32 }
 0x7fc   : > { %v1015_v34 = vpop.f32.mrf.mxu1 }
 0x7fd   : > { %v1016_v35 = vadd.f32 %v1136_v33, %v1015_v34 }
 0x7ff   : > { %v1019_v36 = vadd.f32 %v1016_v35, %v1414_v23 }
 0x801   : > { %1020 = vst.msk [vmem:[%s543_s21] sm:$0x1f] %vm548_vm0, %v1019_v36 }
 0x804   : > { %v1017_v37 = vpop.f32.mrf.mxu1 }
 0x805 PF: > { %s27_s24 = sadd.s32 1, %s1161_s24  }
 0x806   : > { %p24_p4 = scmp.ge.s32.totalorder %s27_s24, 4  }
 0x808   :  { %26 = sbr.rel (!%p24_p4) target bundleno = 3 (0x3), region = 125 }

</bundles_post_ra>
